<compile_context>
chip_gen: v5e
topology: v5e:2x2
jax: 0.10.0
libtpu: 0.0.40
codegen_flags: <defaults>
</compile_context>

<pallas_src>
import functools
from typing import NamedTuple

import jax
import jax.numpy as jnp
from jax.experimental import pallas as pl
from jax.experimental.pallas import tpu as pltpu  # noqa: F401  (TPU backend; not otherwise needed)

K = 3                      # kernel_size=3, stride=1, padding=1 (module defaults)
UP_SIZES = (7, 15, 30)     # nn.Upsample targets hard-coded in the module
NUM_LAYERS = 3


class CAEConfig(NamedTuple):
    cin: int
    c1: int
    c2: int
    c3: int
    latent: int
    lc: int
    L0: int
    o_ew1: int
    o_ew2: int
    o_ew3: int
    o_dw1: int
    o_dw2: int
    o_dw3: int
    o_l1: int
    o_l2: int


# --------------------------------------------------------------------------
# Fused Pallas kernel: whole forward pass in one launch, no scratch
# --------------------------------------------------------------------------
def _cae_kernel(x_ref, w_ref, b_ref, o_ref, *, cfg, B, return_features):
    f32 = jnp.float32
    cin, c1, c2, c3 = cfg.cin, cfg.c1, cfg.c2, cfg.c3
    latent, lc, L0 = cfg.latent, cfg.lc, cfg.L0

    def conv_relu(h, row, ci, co, L):
        """Conv1d(k=3, s=1, p=1) + bias + ReLU on the lane-packed batch tile
        h: (ci, B*L).  Three shifted matmuls; an iota mask zeroes the taps that
        would cross sample boundaries (per-sample padding=1)."""
        BL = B * L
        zc = jnp.zeros((ci, 1), f32)
        sft_r = jnp.concatenate([zc, h[:, 0:BL - 1]], axis=1)   # tap j=0 : x[l-1]
        sft_l = jnp.concatenate([h[:, 1:BL], zc], axis=1)       # tap j=2 : x[l+1]
        col = jax.lax.broadcasted_iota(jnp.int32, (ci, BL), 1)
        for b in range(1, B):                                   # interior sample boundaries
            sft_r = jnp.where(col == b * L, 0.0, sft_r)
            sft_l = jnp.where(col == b * L - 1, 0.0, sft_l)
        w0 = w_ref[row:row + co, 0:ci]
        w1 = w_ref[row:row + co, ci:2 * ci]
        w2 = w_ref[row:row + co, 2 * ci:3 * ci]
        bias = b_ref[row:row + co, 0:1]
        y = (jnp.dot(w0, sft_r, preferred_element_type=f32)
             + jnp.dot(w1, h, preferred_element_type=f32)
             + jnp.dot(w2, sft_l, preferred_element_type=f32)
             + bias)
        return jnp.maximum(y, 0.0)

    def maxpool2(h, L):
        """MaxPool1d(2) (floor mode) on the packed tile: pairwise max via a
        1-lane shift, then an iota-built 0/1 selection matmul picks the per-
        sample even positions (handles odd L and sample packing uniformly)."""
        BL = B * L
        Lo = L // 2
        BLo = B * Lo
        zc = jnp.zeros((h.shape[0], 1), f32)
        m = jnp.maximum(h, jnp.concatenate([h[:, 1:BL], zc], axis=1))
        s_idx = jax.lax.broadcasted_iota(jnp.int32, (BL, BLo), 0)
        d_idx = jax.lax.broadcasted_iota(jnp.int32, (BL, BLo), 1)
        sel = None
        for b in range(B):
            c = ((d_idx >= b * Lo) & (d_idx < (b + 1) * Lo)
                 & (s_idx == b * L + 2 * (d_idx - b * Lo)))
            sel = c if sel is None else (sel | c)
        return jnp.dot(m, jnp.where(sel, 1.0, 0.0), preferred_element_type=f32)

    def upsample(h, Lin, Lout):
        """nn.Upsample(Lout, mode='nearest') on the packed tile via an
        iota-built 0/1 selection matmul (per-sample blocks)."""
        BLi, BLo = B * Lin, B * Lout
        s_idx = jax.lax.broadcasted_iota(jnp.int32, (BLi, BLo), 0)
        d_idx = jax.lax.broadcasted_iota(jnp.int32, (BLi, BLo), 1)
        sel = None
        for b in range(B):
            s_rel = s_idx - b * Lin
            d_rel = d_idx - b * Lout
            c = ((d_idx >= b * Lout) & (d_idx < (b + 1) * Lout)
                 & (s_rel >= 0) & (s_rel < Lin)
                 & (s_rel * Lout <= d_rel * Lin)
                 & (d_rel * Lin < (s_rel + 1) * Lout))
            sel = c if sel is None else (sel | c)
        return jnp.dot(h, jnp.where(sel, 1.0, 0.0), preferred_element_type=f32)

    # ------------------------------ encoder ------------------------------
    h = x_ref[...]                                            # (cin, B*L0)
    L = L0
    h = maxpool2(conv_relu(h, cfg.o_ew1, cin, c1, L), L); L //= 2
    h = maxpool2(conv_relu(h, cfg.o_ew2, c1, c2, L), L); L //= 2
    h = maxpool2(conv_relu(h, cfg.o_ew3, c2, c3, L), L); L //= 2
    # h: (c3, B*lc), column index = b*lc + l

    # ----------------------------- bottleneck ----------------------------
    # linear1: weight columns were pre-permuted to l-major blocks offline, so
    # each position l is one contiguous (latent, c3) slice, contracted against
    # the B position-l columns gathered out of the packed tile by a 0/1 matmul.
    gat_r = jax.lax.broadcasted_iota(jnp.int32, (B * lc, B), 0)
    gat_c = jax.lax.broadcasted_iota(jnp.int32, (B * lc, B), 1)
    z = None
    for l in range(lc):
        w1_l = w_ref[cfg.o_l1:cfg.o_l1 + latent, l * c3:(l + 1) * c3]      # (latent, c3)
        g_l = jnp.where(gat_r == gat_c * lc + l, 1.0, 0.0)                 # (B*lc, B) gather
        h_l = jnp.dot(h, g_l, preferred_element_type=f32)                  # (c3, B)
        t = jnp.dot(w1_l, h_l, preferred_element_type=f32)
        z = t if z is None else z + t
    z = z + b_ref[cfg.o_l1:cfg.o_l1 + latent, 0:1]                         # (latent, B)

    if return_features:
        # Emit a lane-dense (B, latent) tile directly: each tiny column of z is
        # turned into a row with an iota-identity mask + sublane reduce, then
        # scattered to its batch row with a sublane-index mask (no transpose op).
        i0 = jax.lax.broadcasted_iota(jnp.int32, (latent, latent), 0)
        i1 = jax.lax.broadcasted_iota(jnp.int32, (latent, latent), 1)
        eye = jnp.where(i0 == i1, 1.0, 0.0)
        r0 = jax.lax.broadcasted_iota(jnp.int32, (B, latent), 0)
        out = None
        for b in range(B):
            row_b = jnp.sum(z[:, b:b + 1] * eye, axis=0, keepdims=True)    # (1, latent) = z[:, b]
            t = jnp.where(r0 == b, row_b, 0.0)                             # scatter into row b
            out = t if out is None else out + t
        o_ref[...] = out                                                   # (B, latent), one store
        return

    # linear2: rows pre-permuted to l-major blocks; each per-position (c3, B)
    # result is scattered back into the packed (c3, B*lc) decoder input by a
    # 0/1 matmul (no single-lane stores, no scratch).
    scat_r = jax.lax.broadcasted_iota(jnp.int32, (B, B * lc), 0)
    scat_c = jax.lax.broadcasted_iota(jnp.int32, (B, B * lc), 1)
    hd = None
    for l in range(lc):
        w2_l = w_ref[cfg.o_l2 + l * c3:cfg.o_l2 + (l + 1) * c3, 0:latent]  # (c3, latent)
        b2_l = b_ref[cfg.o_l2 + l * c3:cfg.o_l2 + (l + 1) * c3, 0:1]
        d_l = jnp.dot(w2_l, z, preferred_element_type=f32) + b2_l          # (c3, B)
        s_l = jnp.where(scat_c == scat_r * lc + l, 1.0, 0.0)               # (B, B*lc) scatter
        t = jnp.dot(d_l, s_l, preferred_element_type=f32)                  # (c3, B*lc)
        hd = t if hd is None else hd + t
    h = hd                                                                  # (c3, B*lc)

    # ------------------------------ decoder ------------------------------
    h = upsample(conv_relu(h, cfg.o_dw1, c3, c2, lc), lc, UP_SIZES[0])
    h = upsample(conv_relu(h, cfg.o_dw2, c2, c1, UP_SIZES[0]), UP_SIZES[0], UP_SIZES[1])
    h = upsample(conv_relu(h, cfg.o_dw3, c1, cin, UP_SIZES[1]), UP_SIZES[1], UP_SIZES[2])
    o_ref[...] = h                                # (cin, B*30): single lane-dense store


# --------------------------------------------------------------------------
# pallas_call plumbing
# --------------------------------------------------------------------------
def _vmem_spec(shape):
    nd = len(shape)
    return pl.BlockSpec(shape, lambda *_a, _nd=nd: (0,) * _nd)


@functools.partial(jax.jit, static_argnames=("cfg", "return_features"))
def cae_forward(x, wpack, bpack, cfg, return_features=False):
    """Whole Autoencoder forward as one fused Pallas call (3 input DMAs)."""
    B, cin, L0 = x.shape
    # Layout plumbing only: pack the batch into one lane-dense (Cin, B*L0) tile.
    x2 = jnp.transpose(x, (1, 0, 2)).reshape(cin, B * L0)
    out_shape = (B, cfg.latent) if return_features else (cin, B * L0)
    kern = functools.partial(_cae_kernel, cfg=cfg, B=B, return_features=return_features)
    out = pl.pallas_call(
        kern,
        out_shape=jax.ShapeDtypeStruct(out_shape, jnp.float32),
        in_specs=[_vmem_spec(x2.shape), _vmem_spec(wpack.shape), _vmem_spec(bpack.shape)],
        out_specs=_vmem_spec(out_shape),
    )(x2, wpack, bpack)
    if return_features:
        return out                                           # already (B, latent)
    return out.reshape(cin, B, L0).transpose(1, 0, 2)        # unpack to (B, Cin, L0)


# --------------------------------------------------------------------------
# One-time (hoisted) parameter preprocessing — zero per-forward cost
# --------------------------------------------------------------------------
def _conv_w2d(w):
    """Conv1d weight (Cout, Cin, K) -> (Cout, K*Cin); column index j*Cin + c."""
    co, ci, k = w.shape
    return jnp.transpose(w, (0, 2, 1)).reshape(co, k * ci)


def _convT_w2d(w):
    """ConvTranspose1d weight (Cin, Cout, K) -> equivalent flattened Conv1d weight
    (stride=1: flip kernel + swap channel axes)."""
    wc = jnp.transpose(w, (1, 0, 2))[:, :, ::-1]
    return _conv_w2d(wc)


def prepare_params(p, in_channels, out_channels, latent_size, len_seq=30):
    """Flatten/convert conv weights, fold the bottleneck flatten order into the
    linear weights, and pack all 16 parameters into TWO arrays (weights, biases)
    so the kernel needs only 3 input DMAs."""
    cin = in_channels
    c1, c2, c3 = out_channels
    latent = latent_size
    L = len_seq
    for _ in range(NUM_LAYERS):
        L //= 2
    lc = L

    # Bottleneck weights pre-permuted so position-l blocks are contiguous:
    #   W1p[:, l*c3 + c] = l1w[:, c*lc + l]   (PyTorch flatten order is c*lc + l)
    #   W2p[l*c3 + c, :] = l2w[c*lc + l, :]
    l1w = jnp.transpose(p["l1w"].reshape(latent, c3, lc), (0, 2, 1)).reshape(latent, lc * c3)
    l2w = jnp.transpose(p["l2w"].reshape(c3, lc, latent), (1, 0, 2)).reshape(lc * c3, latent)
    l2b = jnp.transpose(p["l2b"].reshape(c3, lc), (1, 0)).reshape(lc * c3)

    blocks = [
        (_conv_w2d(p["ew1"]), p["eb1"]),
        (_conv_w2d(p["ew2"]), p["eb2"]),
        (_conv_w2d(p["ew3"]), p["eb3"]),
        (_convT_w2d(p["dw1"]), p["db1"]),
        (_convT_w2d(p["dw2"]), p["db2"]),
        (_convT_w2d(p["dw3"]), p["db3"]),
        (l1w, p["l1b"]),
        (l2w, l2b),
    ]

    offs, r = [], 0
    for w, _ in blocks:
        offs.append(r)
        r = (r + w.shape[0] + 7) // 8 * 8          # 8-row alignment for clean slices
    rows = r
    width = max(w.shape[1] for w, _ in blocks)

    wpack = jnp.zeros((rows, width), jnp.float32)
    bpack = jnp.zeros((rows, 1), jnp.float32)
    for (w, b), o in zip(blocks, offs):
        wpack = wpack.at[o:o + w.shape[0], 0:w.shape[1]].set(w.astype(jnp.float32))
        bpack = bpack.at[o:o + b.shape[0], 0].set(b.astype(jnp.float32))

    cfg = CAEConfig(cin=cin, c1=c1, c2=c2, c3=c3, latent=latent, lc=lc, L0=len_seq,
                    o_ew1=offs[0], o_ew2=offs[1], o_ew3=offs[2],
                    o_dw1=offs[3], o_dw2=offs[4], o_dw3=offs[5],
                    o_l1=offs[6], o_l2=offs[7])
    return wpack, bpack, cfg


def init_params(key, in_channels, out_channels, latent_size, conv_out_size):
    ks = jax.random.split(key, 16)
    c1, c2, c3 = out_channels

    def u(k, shape, fan_in):
        bound = 1.0 / jnp.sqrt(fan_in)
        return jax.random.uniform(k, shape, jnp.float32, -bound, bound)

    p = {}
    # encoder Conv1d weights (Cout, Cin, K)
    p["ew1"] = u(ks[0], (c1, in_channels, K), in_channels * K)
    p["eb1"] = u(ks[1], (c1,), in_channels * K)
    p["ew2"] = u(ks[2], (c2, c1, K), c1 * K)
    p["eb2"] = u(ks[3], (c2,), c1 * K)
    p["ew3"] = u(ks[4], (c3, c2, K), c2 * K)
    p["eb3"] = u(ks[5], (c3,), c2 * K)
    # bottleneck linears (PyTorch layout: (Fout, Fin))
    p["l1w"] = u(ks[6], (latent_size, conv_out_size), conv_out_size)
    p["l1b"] = u(ks[7], (latent_size,), conv_out_size)
    p["l2w"] = u(ks[8], (conv_out_size, latent_size), latent_size)
    p["l2b"] = u(ks[9], (conv_out_size,), latent_size)
    # decoder ConvTranspose1d weights (Cin, Cout, K)
    p["dw1"] = u(ks[10], (c3, c2, K), c3 * K)
    p["db1"] = u(ks[11], (c2,), c3 * K)
    p["dw2"] = u(ks[12], (c2, c1, K), c2 * K)
    p["db2"] = u(ks[13], (c1,), c2 * K)
    p["dw3"] = u(ks[14], (c1, in_channels, K), c1 * K)
    p["db3"] = u(ks[15], (in_channels,), c1 * K)
    return p


# --------------------------------------------------------------------------
# Pure-JAX reference (mirrors PyTorch semantics) for the sanity check
# --------------------------------------------------------------------------
def _ref_conv1d(x, w, b):
    L = x.shape[-1]
    xp = jnp.pad(x, ((0, 0), (0, 0), (1, 1)))
    patches = jnp.stack([xp[:, :, j:j + L] for j in range(K)], axis=-1)  # (B,Cin,L,K)
    return jnp.einsum("bclj,ocj->bol", patches, w) + b[None, :, None]


def _ref_maxpool2(x):
    lout = x.shape[-1] // 2
    return jnp.maximum(x[:, :, 0:2 * lout:2], x[:, :, 1:2 * lout:2])


def _ref_upsample(x, size):
    lin = x.shape[-1]
    idx = (jnp.arange(size) * lin) // size
    return jnp.take(x, idx, axis=-1)


def _ref_convT_to_conv(w):
    return jnp.transpose(w, (1, 0, 2))[:, :, ::-1]


def reference_forward(x, p, out_channels, return_features=False):
    c3 = out_channels[-1]
    h = _ref_maxpool2(jax.nn.relu(_ref_conv1d(x, p["ew1"], p["eb1"])))
    h = _ref_maxpool2(jax.nn.relu(_ref_conv1d(h, p["ew2"], p["eb2"])))
    h = _ref_maxpool2(jax.nn.relu(_ref_conv1d(h, p["ew3"], p["eb3"])))
    B = h.shape[0]
    h = h.reshape(B, -1)
    z = h @ p["l1w"].T + p["l1b"]
    if return_features:
        return z
    h = z @ p["l2w"].T + p["l2b"]
    h = h.reshape(B, c3, -1)
    h = _ref_upsample(jax.nn.relu(_ref_conv1d(h, _ref_convT_to_conv(p["dw1"]), p["db1"])), 7)
    h = _ref_upsample(jax.nn.relu(_ref_conv1d(h, _ref_convT_to_conv(p["dw2"]), p["db2"])), 15)
    h = _ref_upsample(jax.nn.relu(_ref_conv1d(h, _ref_convT_to_conv(p["dw3"]), p["db3"])), 30)
    return h


# --------------------------------------------------------------------------
if __name__ == "__main__":
    B = 2
    in_channels = 4
    out_channels = (8, 16, 32)
    latent_size = 32
    len_seq = 30
    conv_out_size = out_channels[-1] * 3  # 30 -> 15 -> 7 -> 3

    key = jax.random.PRNGKey(0)
    k_x, k_p = jax.random.split(key)
    x = jax.random.normal(k_x, (B, in_channels, len_seq), jnp.float32)
    params = init_params(k_p, in_channels, out_channels, latent_size, conv_out_size)
    wpack, bpack, cfg = prepare_params(params, in_channels, out_channels, latent_size, len_seq)

    # full reconstruction path
    out = jax.block_until_ready(cae_forward(x, wpack, bpack, cfg))
    assert out.shape == (B, in_channels, len_seq), out.shape
    ref = jax.block_until_ready(reference_forward(x, params, out_channels))
    assert jnp.allclose(out, ref, atol=1e-4, rtol=1e-4), float(jnp.max(jnp.abs(out - ref)))

    # return_features path
    feats = jax.block_until_ready(cae_forward(x, wpack, bpack, cfg, return_features=True))
    ref_f = reference_forward(x, params, out_channels, return_features=True)
    assert feats.shape == (B, latent_size), feats.shape
    assert jnp.allclose(feats, ref_f, atol=1e-4, rtol=1e-4), float(jnp.max(jnp.abs(feats - ref_f)))

    print("KERNEL_OK")
</pallas_src>

<mosaic_0001>
module attributes {stable_mosaic.version = 11 : i64} {
  func.func @_cae_kernel(%arg0: memref<4x60xf32, #tpu.memory_space<vmem>>, %arg1: memref<216x96xf32, #tpu.memory_space<vmem>>, %arg2: memref<216x1xf32, #tpu.memory_space<vmem>>, %arg3: memref<4x60xf32, #tpu.memory_space<vmem>>) attributes {dimension_semantics = [], scalar_prefetch = 0 : i64, scratch_operands = 0 : i64, tpu.core_type = #tpu.core_type<tc>} {
    %c0 = arith.constant 0 : index
    %c0_0 = arith.constant 0 : index
    %0 = vector.load %arg0[%c0, %c0_0] : memref<4x60xf32, #tpu.memory_space<vmem>>, vector<4x60xf32>
    %cst = arith.constant 0.000000e+00 : f32
    %1 = vector.broadcast %cst : f32 to vector<4x1xf32>
    %2 = vector.extract_strided_slice %0 {offsets = [0, 0], sizes = [4, 59], strides = [1, 1]} : vector<4x60xf32> to vector<4x59xf32>
    %3 = tpu.concatenate %1, %2 in 1 : vector<4x1xf32>, vector<4x59xf32> -> vector<4x60xf32>
    %4 = vector.extract_strided_slice %0 {offsets = [0, 1], sizes = [4, 59], strides = [1, 1]} : vector<4x60xf32> to vector<4x59xf32>
    %5 = tpu.concatenate %4, %1 in 1 : vector<4x59xf32>, vector<4x1xf32> -> vector<4x60xf32>
    %6 = tpu.iota {dimensions = array<i32: 1>} : vector<4x60xi32>
    %c30_i32 = arith.constant 30 : i32
    %7 = vector.broadcast %c30_i32 : i32 to vector<4x60xi32>
    %8 = arith.cmpi eq, %6, %7 : vector<4x60xi32>
    %cst_1 = arith.constant 0.000000e+00 : f32
    %9 = vector.broadcast %cst_1 : f32 to vector<4x60xf32>
    %10 = arith.select %8, %9, %3 : vector<4x60xi1>, vector<4x60xf32>
    %c29_i32 = arith.constant 29 : i32
    %11 = vector.broadcast %c29_i32 : i32 to vector<4x60xi32>
    %12 = arith.cmpi eq, %6, %11 : vector<4x60xi32>
    %cst_2 = arith.constant 0.000000e+00 : f32
    %13 = vector.broadcast %cst_2 : f32 to vector<4x60xf32>
    %14 = arith.select %12, %13, %5 : vector<4x60xi1>, vector<4x60xf32>
    %c0_3 = arith.constant 0 : index
    %c0_4 = arith.constant 0 : index
    %15 = vector.load %arg1[%c0_3, %c0_4] : memref<216x96xf32, #tpu.memory_space<vmem>>, vector<8x4xf32>
    %c0_5 = arith.constant 0 : index
    %c4 = arith.constant 4 : index
    %16 = vector.load %arg1[%c0_5, %c4] : memref<216x96xf32, #tpu.memory_space<vmem>>, vector<8x4xf32>
    %c0_6 = arith.constant 0 : index
    %c8 = arith.constant 8 : index
    %17 = vector.load %arg1[%c0_6, %c8] : memref<216x96xf32, #tpu.memory_space<vmem>>, vector<8x4xf32>
    %c0_7 = arith.constant 0 : index
    %c0_8 = arith.constant 0 : index
    %18 = vector.load %arg2[%c0_7, %c0_8] : memref<216x1xf32, #tpu.memory_space<vmem>>, vector<8x1xf32>
    %cst_9 = arith.constant dense<0.000000e+00> : vector<8x60xf32>
    %19 = tpu.matmul %15, %10, %cst_9 {dimension_numbers = #tpu.dot_dimension_numbers<[1], [0], [0], [1], [0, 0, 1, 1], [], []>} : vector<8x4xf32>, vector<4x60xf32>, vector<8x60xf32> -> vector<8x60xf32>
    %cst_10 = arith.constant dense<0.000000e+00> : vector<8x60xf32>
    %20 = tpu.matmul %16, %0, %cst_10 {dimension_numbers = #tpu.dot_dimension_numbers<[1], [0], [0], [1], [0, 0, 1, 1], [], []>} : vector<8x4xf32>, vector<4x60xf32>, vector<8x60xf32> -> vector<8x60xf32>
    %21 = arith.addf %19, %20 : vector<8x60xf32>
    %cst_11 = arith.constant dense<0.000000e+00> : vector<8x60xf32>
    %22 = tpu.matmul %17, %14, %cst_11 {dimension_numbers = #tpu.dot_dimension_numbers<[1], [0], [0], [1], [0, 0, 1, 1], [], []>} : vector<8x4xf32>, vector<4x60xf32>, vector<8x60xf32> -> vector<8x60xf32>
    %23 = arith.addf %21, %22 : vector<8x60xf32>
    %24 = vector.broadcast %18 : vector<8x1xf32> to vector<8x60xf32>
    %25 = arith.addf %23, %24 : vector<8x60xf32>
    %cst_12 = arith.constant 0.000000e+00 : f32
    %26 = vector.broadcast %cst_12 : f32 to vector<8x60xf32>
    %27 = arith.maximumf %25, %26 : vector<8x60xf32>
    %cst_13 = arith.constant 0.000000e+00 : f32
    %28 = vector.broadcast %cst_13 : f32 to vector<8x1xf32>
    %29 = vector.extract_strided_slice %27 {offsets = [0, 1], sizes = [8, 59], strides = [1, 1]} : vector<8x60xf32> to vector<8x59xf32>
    %30 = tpu.concatenate %29, %28 in 1 : vector<8x59xf32>, vector<8x1xf32> -> vector<8x60xf32>
    %31 = arith.maximumf %27, %30 : vector<8x60xf32>
    %32 = tpu.iota {dimensions = array<i32: 0>} : vector<60x30xi32>
    %33 = tpu.iota {dimensions = array<i32: 1>} : vector<60x30xi32>
    %c0_i32 = arith.constant 0 : i32
    %34 = vector.broadcast %c0_i32 : i32 to vector<60x30xi32>
    %35 = arith.cmpi sge, %33, %34 : vector<60x30xi32>
    %c15_i32 = arith.constant 15 : i32
    %36 = vector.broadcast %c15_i32 : i32 to vector<60x30xi32>
    %37 = arith.cmpi slt, %33, %36 : vector<60x30xi32>
    %38 = arith.andi %35, %37 : vector<60x30xi1>
    %c0_i32_14 = arith.constant 0 : i32
    %39 = vector.broadcast %c0_i32_14 : i32 to vector<60x30xi32>
    %40 = arith.subi %33, %39 : vector<60x30xi32>
    %c2_i32 = arith.constant 2 : i32
    %41 = vector.broadcast %c2_i32 : i32 to vector<60x30xi32>
    %42 = arith.muli %41, %40 : vector<60x30xi32>
    %c0_i32_15 = arith.constant 0 : i32
    %43 = vector.broadcast %c0_i32_15 : i32 to vector<60x30xi32>
    %44 = arith.addi %43, %42 : vector<60x30xi32>
    %45 = arith.cmpi eq, %32, %44 : vector<60x30xi32>
    %46 = arith.andi %38, %45 : vector<60x30xi1>
    %c15_i32_16 = arith.constant 15 : i32
    %47 = vector.broadcast %c15_i32_16 : i32 to vector<60x30xi32>
    %48 = arith.cmpi sge, %33, %47 : vector<60x30xi32>
    %c30_i32_17 = arith.constant 30 : i32
    %49 = vector.broadcast %c30_i32_17 : i32 to vector<60x30xi32>
    %50 = arith.cmpi slt, %33, %49 : vector<60x30xi32>
    %51 = arith.andi %48, %50 : vector<60x30xi1>
    %c15_i32_18 = arith.constant 15 : i32
    %52 = vector.broadcast %c15_i32_18 : i32 to vector<60x30xi32>
    %53 = arith.subi %33, %52 : vector<60x30xi32>
    %c2_i32_19 = arith.constant 2 : i32
    %54 = vector.broadcast %c2_i32_19 : i32 to vector<60x30xi32>
    %55 = arith.muli %54, %53 : vector<60x30xi32>
    %c30_i32_20 = arith.constant 30 : i32
    %56 = vector.broadcast %c30_i32_20 : i32 to vector<60x30xi32>
    %57 = arith.addi %56, %55 : vector<60x30xi32>
    %58 = arith.cmpi eq, %32, %57 : vector<60x30xi32>
    %59 = arith.andi %51, %58 : vector<60x30xi1>
    %60 = arith.ori %46, %59 : vector<60x30xi1>
    %cst_21 = arith.constant 1.000000e+00 : f32
    %cst_22 = arith.constant 0.000000e+00 : f32
    %61 = vector.broadcast %cst_21 : f32 to vector<60x30xf32>
    %62 = vector.broadcast %cst_22 : f32 to vector<60x30xf32>
    %63 = arith.select %60, %61, %62 : vector<60x30xi1>, vector<60x30xf32>
    %cst_23 = arith.constant dense<0.000000e+00> : vector<8x30xf32>
    %64 = tpu.matmul %31, %63, %cst_23 {dimension_numbers = #tpu.dot_dimension_numbers<[1], [0], [0], [1], [0, 0, 1, 1], [], []>} : vector<8x60xf32>, vector<60x30xf32>, vector<8x30xf32> -> vector<8x30xf32>
    %cst_24 = arith.constant 0.000000e+00 : f32
    %65 = vector.broadcast %cst_24 : f32 to vector<8x1xf32>
    %66 = vector.extract_strided_slice %64 {offsets = [0, 0], sizes = [8, 29], strides = [1, 1]} : vector<8x30xf32> to vector<8x29xf32>
    %67 = tpu.concatenate %65, %66 in 1 : vector<8x1xf32>, vector<8x29xf32> -> vector<8x30xf32>
    %68 = vector.extract_strided_slice %64 {offsets = [0, 1], sizes = [8, 29], strides = [1, 1]} : vector<8x30xf32> to vector<8x29xf32>
    %69 = tpu.concatenate %68, %65 in 1 : vector<8x29xf32>, vector<8x1xf32> -> vector<8x30xf32>
    %70 = tpu.iota {dimensions = array<i32: 1>} : vector<8x30xi32>
    %c15_i32_25 = arith.constant 15 : i32
    %71 = vector.broadcast %c15_i32_25 : i32 to vector<8x30xi32>
    %72 = arith.cmpi eq, %70, %71 : vector<8x30xi32>
    %cst_26 = arith.constant 0.000000e+00 : f32
    %73 = vector.broadcast %cst_26 : f32 to vector<8x30xf32>
    %74 = arith.select %72, %73, %67 : vector<8x30xi1>, vector<8x30xf32>
    %c14_i32 = arith.constant 14 : i32
    %75 = vector.broadcast %c14_i32 : i32 to vector<8x30xi32>
    %76 = arith.cmpi eq, %70, %75 : vector<8x30xi32>
    %cst_27 = arith.constant 0.000000e+00 : f32
    %77 = vector.broadcast %cst_27 : f32 to vector<8x30xf32>
    %78 = arith.select %76, %77, %69 : vector<8x30xi1>, vector<8x30xf32>
    %c8_28 = arith.constant 8 : index
    %c0_29 = arith.constant 0 : index
    %79 = vector.load %arg1[%c8_28, %c0_29] : memref<216x96xf32, #tpu.memory_space<vmem>>, vector<16x8xf32>
    %c8_30 = arith.constant 8 : index
    %c8_31 = arith.constant 8 : index
    %80 = vector.load %arg1[%c8_30, %c8_31] : memref<216x96xf32, #tpu.memory_space<vmem>>, vector<16x8xf32>
    %c8_32 = arith.constant 8 : index
    %c16 = arith.constant 16 : index
    %81 = vector.load %arg1[%c8_32, %c16] : memref<216x96xf32, #tpu.memory_space<vmem>>, vector<16x8xf32>
    %c8_33 = arith.constant 8 : index
    %c0_34 = arith.constant 0 : index
    %82 = vector.load %arg2[%c8_33, %c0_34] : memref<216x1xf32, #tpu.memory_space<vmem>>, vector<16x1xf32>
    %cst_35 = arith.constant dense<0.000000e+00> : vector<16x30xf32>
    %83 = tpu.matmul %79, %74, %cst_35 {dimension_numbers = #tpu.dot_dimension_numbers<[1], [0], [0], [1], [0, 0, 1, 1], [], []>} : vector<16x8xf32>, vector<8x30xf32>, vector<16x30xf32> -> vector<16x30xf32>
    %cst_36 = arith.constant dense<0.000000e+00> : vector<16x30xf32>
    %84 = tpu.matmul %80, %64, %cst_36 {dimension_numbers = #tpu.dot_dimension_numbers<[1], [0], [0], [1], [0, 0, 1, 1], [], []>} : vector<16x8xf32>, vector<8x30xf32>, vector<16x30xf32> -> vector<16x30xf32>
    %85 = arith.addf %83, %84 : vector<16x30xf32>
    %cst_37 = arith.constant dense<0.000000e+00> : vector<16x30xf32>
    %86 = tpu.matmul %81, %78, %cst_37 {dimension_numbers = #tpu.dot_dimension_numbers<[1], [0], [0], [1], [0, 0, 1, 1], [], []>} : vector<16x8xf32>, vector<8x30xf32>, vector<16x30xf32> -> vector<16x30xf32>
    %87 = arith.addf %85, %86 : vector<16x30xf32>
    %88 = vector.broadcast %82 : vector<16x1xf32> to vector<16x30xf32>
    %89 = arith.addf %87, %88 : vector<16x30xf32>
    %cst_38 = arith.constant 0.000000e+00 : f32
    %90 = vector.broadcast %cst_38 : f32 to vector<16x30xf32>
    %91 = arith.maximumf %89, %90 : vector<16x30xf32>
    %cst_39 = arith.constant 0.000000e+00 : f32
    %92 = vector.broadcast %cst_39 : f32 to vector<16x1xf32>
    %93 = vector.extract_strided_slice %91 {offsets = [0, 1], sizes = [16, 29], strides = [1, 1]} : vector<16x30xf32> to vector<16x29xf32>
    %94 = tpu.concatenate %93, %92 in 1 : vector<16x29xf32>, vector<16x1xf32> -> vector<16x30xf32>
    %95 = arith.maximumf %91, %94 : vector<16x30xf32>
    %96 = tpu.iota {dimensions = array<i32: 0>} : vector<30x14xi32>
    %97 = tpu.iota {dimensions = array<i32: 1>} : vector<30x14xi32>
    %c0_i32_40 = arith.constant 0 : i32
    %98 = vector.broadcast %c0_i32_40 : i32 to vector<30x14xi32>
    %99 = arith.cmpi sge, %97, %98 : vector<30x14xi32>
    %c7_i32 = arith.constant 7 : i32
    %100 = vector.broadcast %c7_i32 : i32 to vector<30x14xi32>
    %101 = arith.cmpi slt, %97, %100 : vector<30x14xi32>
    %102 = arith.andi %99, %101 : vector<30x14xi1>
    %c0_i32_41 = arith.constant 0 : i32
    %103 = vector.broadcast %c0_i32_41 : i32 to vector<30x14xi32>
    %104 = arith.subi %97, %103 : vector<30x14xi32>
    %c2_i32_42 = arith.constant 2 : i32
    %105 = vector.broadcast %c2_i32_42 : i32 to vector<30x14xi32>
    %106 = arith.muli %105, %104 : vector<30x14xi32>
    %c0_i32_43 = arith.constant 0 : i32
    %107 = vector.broadcast %c0_i32_43 : i32 to vector<30x14xi32>
    %108 = arith.addi %107, %106 : vector<30x14xi32>
    %109 = arith.cmpi eq, %96, %108 : vector<30x14xi32>
    %110 = arith.andi %102, %109 : vector<30x14xi1>
    %c7_i32_44 = arith.constant 7 : i32
    %111 = vector.broadcast %c7_i32_44 : i32 to vector<30x14xi32>
    %112 = arith.cmpi sge, %97, %111 : vector<30x14xi32>
    %c14_i32_45 = arith.constant 14 : i32
    %113 = vector.broadcast %c14_i32_45 : i32 to vector<30x14xi32>
    %114 = arith.cmpi slt, %97, %113 : vector<30x14xi32>
    %115 = arith.andi %112, %114 : vector<30x14xi1>
    %c7_i32_46 = arith.constant 7 : i32
    %116 = vector.broadcast %c7_i32_46 : i32 to vector<30x14xi32>
    %117 = arith.subi %97, %116 : vector<30x14xi32>
    %c2_i32_47 = arith.constant 2 : i32
    %118 = vector.broadcast %c2_i32_47 : i32 to vector<30x14xi32>
    %119 = arith.muli %118, %117 : vector<30x14xi32>
    %c15_i32_48 = arith.constant 15 : i32
    %120 = vector.broadcast %c15_i32_48 : i32 to vector<30x14xi32>
    %121 = arith.addi %120, %119 : vector<30x14xi32>
    %122 = arith.cmpi eq, %96, %121 : vector<30x14xi32>
    %123 = arith.andi %115, %122 : vector<30x14xi1>
    %124 = arith.ori %110, %123 : vector<30x14xi1>
    %cst_49 = arith.constant 1.000000e+00 : f32
    %cst_50 = arith.constant 0.000000e+00 : f32
    %125 = vector.broadcast %cst_49 : f32 to vector<30x14xf32>
    %126 = vector.broadcast %cst_50 : f32 to vector<30x14xf32>
    %127 = arith.select %124, %125, %126 : vector<30x14xi1>, vector<30x14xf32>
    %cst_51 = arith.constant dense<0.000000e+00> : vector<16x14xf32>
    %128 = tpu.matmul %95, %127, %cst_51 {dimension_numbers = #tpu.dot_dimension_numbers<[1], [0], [0], [1], [0, 0, 1, 1], [], []>} : vector<16x30xf32>, vector<30x14xf32>, vector<16x14xf32> -> vector<16x14xf32>
    %cst_52 = arith.constant 0.000000e+00 : f32
    %129 = vector.broadcast %cst_52 : f32 to vector<16x1xf32>
    %130 = vector.extract_strided_slice %128 {offsets = [0, 0], sizes = [16, 13], strides = [1, 1]} : vector<16x14xf32> to vector<16x13xf32>
    %131 = tpu.concatenate %129, %130 in 1 : vector<16x1xf32>, vector<16x13xf32> -> vector<16x14xf32>
    %132 = vector.extract_strided_slice %128 {offsets = [0, 1], sizes = [16, 13], strides = [1, 1]} : vector<16x14xf32> to vector<16x13xf32>
    %133 = tpu.concatenate %132, %129 in 1 : vector<16x13xf32>, vector<16x1xf32> -> vector<16x14xf32>
    %134 = tpu.iota {dimensions = array<i32: 1>} : vector<16x14xi32>
    %c7_i32_53 = arith.constant 7 : i32
    %135 = vector.broadcast %c7_i32_53 : i32 to vector<16x14xi32>
    %136 = arith.cmpi eq, %134, %135 : vector<16x14xi32>
    %cst_54 = arith.constant 0.000000e+00 : f32
    %137 = vector.broadcast %cst_54 : f32 to vector<16x14xf32>
    %138 = arith.select %136, %137, %131 : vector<16x14xi1>, vector<16x14xf32>
    %c6_i32 = arith.constant 6 : i32
    %139 = vector.broadcast %c6_i32 : i32 to vector<16x14xi32>
    %140 = arith.cmpi eq, %134, %139 : vector<16x14xi32>
    %cst_55 = arith.constant 0.000000e+00 : f32
    %141 = vector.broadcast %cst_55 : f32 to vector<16x14xf32>
    %142 = arith.select %140, %141, %133 : vector<16x14xi1>, vector<16x14xf32>
    %c24 = arith.constant 24 : index
    %c0_56 = arith.constant 0 : index
    %143 = vector.load %arg1[%c24, %c0_56] : memref<216x96xf32, #tpu.memory_space<vmem>>, vector<32x16xf32>
    %c24_57 = arith.constant 24 : index
    %c16_58 = arith.constant 16 : index
    %144 = vector.load %arg1[%c24_57, %c16_58] : memref<216x96xf32, #tpu.memory_space<vmem>>, vector<32x16xf32>
    %c24_59 = arith.constant 24 : index
    %c32 = arith.constant 32 : index
    %145 = vector.load %arg1[%c24_59, %c32] : memref<216x96xf32, #tpu.memory_space<vmem>>, vector<32x16xf32>
    %c24_60 = arith.constant 24 : index
    %c0_61 = arith.constant 0 : index
    %146 = vector.load %arg2[%c24_60, %c0_61] : memref<216x1xf32, #tpu.memory_space<vmem>>, vector<32x1xf32>
    %cst_62 = arith.constant dense<0.000000e+00> : vector<32x14xf32>
    %147 = tpu.matmul %143, %138, %cst_62 {dimension_numbers = #tpu.dot_dimension_numbers<[1], [0], [0], [1], [0, 0, 1, 1], [], []>} : vector<32x16xf32>, vector<16x14xf32>, vector<32x14xf32> -> vector<32x14xf32>
    %cst_63 = arith.constant dense<0.000000e+00> : vector<32x14xf32>
    %148 = tpu.matmul %144, %128, %cst_63 {dimension_numbers = #tpu.dot_dimension_numbers<[1], [0], [0], [1], [0, 0, 1, 1], [], []>} : vector<32x16xf32>, vector<16x14xf32>, vector<32x14xf32> -> vector<32x14xf32>
    %149 = arith.addf %147, %148 : vector<32x14xf32>
    %cst_64 = arith.constant dense<0.000000e+00> : vector<32x14xf32>
    %150 = tpu.matmul %145, %142, %cst_64 {dimension_numbers = #tpu.dot_dimension_numbers<[1], [0], [0], [1], [0, 0, 1, 1], [], []>} : vector<32x16xf32>, vector<16x14xf32>, vector<32x14xf32> -> vector<32x14xf32>
    %151 = arith.addf %149, %150 : vector<32x14xf32>
    %152 = vector.broadcast %146 : vector<32x1xf32> to vector<32x14xf32>
    %153 = arith.addf %151, %152 : vector<32x14xf32>
    %cst_65 = arith.constant 0.000000e+00 : f32
    %154 = vector.broadcast %cst_65 : f32 to vector<32x14xf32>
    %155 = arith.maximumf %153, %154 : vector<32x14xf32>
    %cst_66 = arith.constant 0.000000e+00 : f32
    %156 = vector.broadcast %cst_66 : f32 to vector<32x1xf32>
    %157 = vector.extract_strided_slice %155 {offsets = [0, 1], sizes = [32, 13], strides = [1, 1]} : vector<32x14xf32> to vector<32x13xf32>
    %158 = tpu.concatenate %157, %156 in 1 : vector<32x13xf32>, vector<32x1xf32> -> vector<32x14xf32>
    %159 = arith.maximumf %155, %158 : vector<32x14xf32>
    %160 = tpu.iota {dimensions = array<i32: 0>} : vector<14x6xi32>
    %161 = tpu.iota {dimensions = array<i32: 1>} : vector<14x6xi32>
    %c0_i32_67 = arith.constant 0 : i32
    %162 = vector.broadcast %c0_i32_67 : i32 to vector<14x6xi32>
    %163 = arith.cmpi sge, %161, %162 : vector<14x6xi32>
    %c3_i32 = arith.constant 3 : i32
    %164 = vector.broadcast %c3_i32 : i32 to vector<14x6xi32>
    %165 = arith.cmpi slt, %161, %164 : vector<14x6xi32>
    %166 = arith.andi %163, %165 : vector<14x6xi1>
    %c0_i32_68 = arith.constant 0 : i32
    %167 = vector.broadcast %c0_i32_68 : i32 to vector<14x6xi32>
    %168 = arith.subi %161, %167 : vector<14x6xi32>
    %c2_i32_69 = arith.constant 2 : i32
    %169 = vector.broadcast %c2_i32_69 : i32 to vector<14x6xi32>
    %170 = arith.muli %169, %168 : vector<14x6xi32>
    %c0_i32_70 = arith.constant 0 : i32
    %171 = vector.broadcast %c0_i32_70 : i32 to vector<14x6xi32>
    %172 = arith.addi %171, %170 : vector<14x6xi32>
    %173 = arith.cmpi eq, %160, %172 : vector<14x6xi32>
    %174 = arith.andi %166, %173 : vector<14x6xi1>
    %c3_i32_71 = arith.constant 3 : i32
    %175 = vector.broadcast %c3_i32_71 : i32 to vector<14x6xi32>
    %176 = arith.cmpi sge, %161, %175 : vector<14x6xi32>
    %c6_i32_72 = arith.constant 6 : i32
    %177 = vector.broadcast %c6_i32_72 : i32 to vector<14x6xi32>
    %178 = arith.cmpi slt, %161, %177 : vector<14x6xi32>
    %179 = arith.andi %176, %178 : vector<14x6xi1>
    %c3_i32_73 = arith.constant 3 : i32
    %180 = vector.broadcast %c3_i32_73 : i32 to vector<14x6xi32>
    %181 = arith.subi %161, %180 : vector<14x6xi32>
    %c2_i32_74 = arith.constant 2 : i32
    %182 = vector.broadcast %c2_i32_74 : i32 to vector<14x6xi32>
    %183 = arith.muli %182, %181 : vector<14x6xi32>
    %c7_i32_75 = arith.constant 7 : i32
    %184 = vector.broadcast %c7_i32_75 : i32 to vector<14x6xi32>
    %185 = arith.addi %184, %183 : vector<14x6xi32>
    %186 = arith.cmpi eq, %160, %185 : vector<14x6xi32>
    %187 = arith.andi %179, %186 : vector<14x6xi1>
    %188 = arith.ori %174, %187 : vector<14x6xi1>
    %cst_76 = arith.constant 1.000000e+00 : f32
    %cst_77 = arith.constant 0.000000e+00 : f32
    %189 = vector.broadcast %cst_76 : f32 to vector<14x6xf32>
    %190 = vector.broadcast %cst_77 : f32 to vector<14x6xf32>
    %191 = arith.select %188, %189, %190 : vector<14x6xi1>, vector<14x6xf32>
    %cst_78 = arith.constant dense<0.000000e+00> : vector<32x6xf32>
    %192 = tpu.matmul %159, %191, %cst_78 {dimension_numbers = #tpu.dot_dimension_numbers<[1], [0], [0], [1], [0, 0, 1, 1], [], []>} : vector<32x14xf32>, vector<14x6xf32>, vector<32x6xf32> -> vector<32x6xf32>
    %193 = tpu.iota {dimensions = array<i32: 0>} : vector<6x2xi32>
    %194 = tpu.iota {dimensions = array<i32: 1>} : vector<6x2xi32>
    %c88 = arith.constant 88 : index
    %c0_79 = arith.constant 0 : index
    %195 = vector.load %arg1[%c88, %c0_79] : memref<216x96xf32, #tpu.memory_space<vmem>>, vector<32x32xf32>
    %c3_i32_80 = arith.constant 3 : i32
    %196 = vector.broadcast %c3_i32_80 : i32 to vector<6x2xi32>
    %197 = arith.muli %194, %196 : vector<6x2xi32>
    %c0_i32_81 = arith.constant 0 : i32
    %198 = vector.broadcast %c0_i32_81 : i32 to vector<6x2xi32>
    %199 = arith.addi %197, %198 : vector<6x2xi32>
    %200 = arith.cmpi eq, %193, %199 : vector<6x2xi32>
    %cst_82 = arith.constant 1.000000e+00 : f32
    %cst_83 = arith.constant 0.000000e+00 : f32
    %201 = vector.broadcast %cst_82 : f32 to vector<6x2xf32>
    %202 = vector.broadcast %cst_83 : f32 to vector<6x2xf32>
    %203 = arith.select %200, %201, %202 : vector<6x2xi1>, vector<6x2xf32>
    %cst_84 = arith.constant dense<0.000000e+00> : vector<32x2xf32>
    %204 = tpu.matmul %192, %203, %cst_84 {dimension_numbers = #tpu.dot_dimension_numbers<[1], [0], [0], [1], [0, 0, 1, 1], [], []>} : vector<32x6xf32>, vector<6x2xf32>, vector<32x2xf32> -> vector<32x2xf32>
    %cst_85 = arith.constant dense<0.000000e+00> : vector<32x2xf32>
    %205 = tpu.matmul %195, %204, %cst_85 {dimension_numbers = #tpu.dot_dimension_numbers<[1], [0], [0], [1], [0, 0, 1, 1], [], []>} : vector<32x32xf32>, vector<32x2xf32>, vector<32x2xf32> -> vector<32x2xf32>
    %c88_86 = arith.constant 88 : index
    %c32_87 = arith.constant 32 : index
    %206 = vector.load %arg1[%c88_86, %c32_87] : memref<216x96xf32, #tpu.memory_space<vmem>>, vector<32x32xf32>
    %c3_i32_88 = arith.constant 3 : i32
    %207 = vector.broadcast %c3_i32_88 : i32 to vector<6x2xi32>
    %208 = arith.muli %194, %207 : vector<6x2xi32>
    %c1_i32 = arith.constant 1 : i32
    %209 = vector.broadcast %c1_i32 : i32 to vector<6x2xi32>
    %210 = arith.addi %208, %209 : vector<6x2xi32>
    %211 = arith.cmpi eq, %193, %210 : vector<6x2xi32>
    %cst_89 = arith.constant 1.000000e+00 : f32
    %cst_90 = arith.constant 0.000000e+00 : f32
    %212 = vector.broadcast %cst_89 : f32 to vector<6x2xf32>
    %213 = vector.broadcast %cst_90 : f32 to vector<6x2xf32>
    %214 = arith.select %211, %212, %213 : vector<6x2xi1>, vector<6x2xf32>
    %cst_91 = arith.constant dense<0.000000e+00> : vector<32x2xf32>
    %215 = tpu.matmul %192, %214, %cst_91 {dimension_numbers = #tpu.dot_dimension_numbers<[1], [0], [0], [1], [0, 0, 1, 1], [], []>} : vector<32x6xf32>, vector<6x2xf32>, vector<32x2xf32> -> vector<32x2xf32>
    %cst_92 = arith.constant dense<0.000000e+00> : vector<32x2xf32>
    %216 = tpu.matmul %206, %215, %cst_92 {dimension_numbers = #tpu.dot_dimension_numbers<[1], [0], [0], [1], [0, 0, 1, 1], [], []>} : vector<32x32xf32>, vector<32x2xf32>, vector<32x2xf32> -> vector<32x2xf32>
    %217 = arith.addf %205, %216 : vector<32x2xf32>
    %c88_93 = arith.constant 88 : index
    %c64 = arith.constant 64 : index
    %218 = vector.load %arg1[%c88_93, %c64] : memref<216x96xf32, #tpu.memory_space<vmem>>, vector<32x32xf32>
    %c3_i32_94 = arith.constant 3 : i32
    %219 = vector.broadcast %c3_i32_94 : i32 to vector<6x2xi32>
    %220 = arith.muli %194, %219 : vector<6x2xi32>
    %c2_i32_95 = arith.constant 2 : i32
    %221 = vector.broadcast %c2_i32_95 : i32 to vector<6x2xi32>
    %222 = arith.addi %220, %221 : vector<6x2xi32>
    %223 = arith.cmpi eq, %193, %222 : vector<6x2xi32>
    %cst_96 = arith.constant 1.000000e+00 : f32
    %cst_97 = arith.constant 0.000000e+00 : f32
    %224 = vector.broadcast %cst_96 : f32 to vector<6x2xf32>
    %225 = vector.broadcast %cst_97 : f32 to vector<6x2xf32>
    %226 = arith.select %223, %224, %225 : vector<6x2xi1>, vector<6x2xf32>
    %cst_98 = arith.constant dense<0.000000e+00> : vector<32x2xf32>
    %227 = tpu.matmul %192, %226, %cst_98 {dimension_numbers = #tpu.dot_dimension_numbers<[1], [0], [0], [1], [0, 0, 1, 1], [], []>} : vector<32x6xf32>, vector<6x2xf32>, vector<32x2xf32> -> vector<32x2xf32>
    %cst_99 = arith.constant dense<0.000000e+00> : vector<32x2xf32>
    %228 = tpu.matmul %218, %227, %cst_99 {dimension_numbers = #tpu.dot_dimension_numbers<[1], [0], [0], [1], [0, 0, 1, 1], [], []>} : vector<32x32xf32>, vector<32x2xf32>, vector<32x2xf32> -> vector<32x2xf32>
    %229 = arith.addf %217, %228 : vector<32x2xf32>
    %c88_100 = arith.constant 88 : index
    %c0_101 = arith.constant 0 : index
    %230 = vector.load %arg2[%c88_100, %c0_101] : memref<216x1xf32, #tpu.memory_space<vmem>>, vector<32x1xf32>
    %231 = vector.broadcast %230 : vector<32x1xf32> to vector<32x2xf32>
    %232 = arith.addf %229, %231 : vector<32x2xf32>
    %233 = tpu.iota {dimensions = array<i32: 0>} : vector<2x6xi32>
    %234 = tpu.iota {dimensions = array<i32: 1>} : vector<2x6xi32>
    %c120 = arith.constant 120 : index
    %c0_102 = arith.constant 0 : index
    %235 = vector.load %arg1[%c120, %c0_102] : memref<216x96xf32, #tpu.memory_space<vmem>>, vector<32x32xf32>
    %c120_103 = arith.constant 120 : index
    %c0_104 = arith.constant 0 : index
    %236 = vector.load %arg2[%c120_103, %c0_104] : memref<216x1xf32, #tpu.memory_space<vmem>>, vector<32x1xf32>
    %cst_105 = arith.constant dense<0.000000e+00> : vector<32x2xf32>
    %237 = tpu.matmul %235, %232, %cst_105 {dimension_numbers = #tpu.dot_dimension_numbers<[1], [0], [0], [1], [0, 0, 1, 1], [], []>} : vector<32x32xf32>, vector<32x2xf32>, vector<32x2xf32> -> vector<32x2xf32>
    %238 = vector.broadcast %236 : vector<32x1xf32> to vector<32x2xf32>
    %239 = arith.addf %237, %238 : vector<32x2xf32>
    %c3_i32_106 = arith.constant 3 : i32
    %240 = vector.broadcast %c3_i32_106 : i32 to vector<2x6xi32>
    %241 = arith.muli %233, %240 : vector<2x6xi32>
    %c0_i32_107 = arith.constant 0 : i32
    %242 = vector.broadcast %c0_i32_107 : i32 to vector<2x6xi32>
    %243 = arith.addi %241, %242 : vector<2x6xi32>
    %244 = arith.cmpi eq, %234, %243 : vector<2x6xi32>
    %cst_108 = arith.constant 1.000000e+00 : f32
    %cst_109 = arith.constant 0.000000e+00 : f32
    %245 = vector.broadcast %cst_108 : f32 to vector<2x6xf32>
    %246 = vector.broadcast %cst_109 : f32 to vector<2x6xf32>
    %247 = arith.select %244, %245, %246 : vector<2x6xi1>, vector<2x6xf32>
    %cst_110 = arith.constant dense<0.000000e+00> : vector<32x6xf32>
    %248 = tpu.matmul %239, %247, %cst_110 {dimension_numbers = #tpu.dot_dimension_numbers<[1], [0], [0], [1], [0, 0, 1, 1], [], []>} : vector<32x2xf32>, vector<2x6xf32>, vector<32x6xf32> -> vector<32x6xf32>
    %c152 = arith.constant 152 : index
    %c0_111 = arith.constant 0 : index
    %249 = vector.load %arg1[%c152, %c0_111] : memref<216x96xf32, #tpu.memory_space<vmem>>, vector<32x32xf32>
    %c152_112 = arith.constant 152 : index
    %c0_113 = arith.constant 0 : index
    %250 = vector.load %arg2[%c152_112, %c0_113] : memref<216x1xf32, #tpu.memory_space<vmem>>, vector<32x1xf32>
    %cst_114 = arith.constant dense<0.000000e+00> : vector<32x2xf32>
    %251 = tpu.matmul %249, %232, %cst_114 {dimension_numbers = #tpu.dot_dimension_numbers<[1], [0], [0], [1], [0, 0, 1, 1], [], []>} : vector<32x32xf32>, vector<32x2xf32>, vector<32x2xf32> -> vector<32x2xf32>
    %252 = vector.broadcast %250 : vector<32x1xf32> to vector<32x2xf32>
    %253 = arith.addf %251, %252 : vector<32x2xf32>
    %c3_i32_115 = arith.constant 3 : i32
    %254 = vector.broadcast %c3_i32_115 : i32 to vector<2x6xi32>
    %255 = arith.muli %233, %254 : vector<2x6xi32>
    %c1_i32_116 = arith.constant 1 : i32
    %256 = vector.broadcast %c1_i32_116 : i32 to vector<2x6xi32>
    %257 = arith.addi %255, %256 : vector<2x6xi32>
    %258 = arith.cmpi eq, %234, %257 : vector<2x6xi32>
    %cst_117 = arith.constant 1.000000e+00 : f32
    %cst_118 = arith.constant 0.000000e+00 : f32
    %259 = vector.broadcast %cst_117 : f32 to vector<2x6xf32>
    %260 = vector.broadcast %cst_118 : f32 to vector<2x6xf32>
    %261 = arith.select %258, %259, %260 : vector<2x6xi1>, vector<2x6xf32>
    %cst_119 = arith.constant dense<0.000000e+00> : vector<32x6xf32>
    %262 = tpu.matmul %253, %261, %cst_119 {dimension_numbers = #tpu.dot_dimension_numbers<[1], [0], [0], [1], [0, 0, 1, 1], [], []>} : vector<32x2xf32>, vector<2x6xf32>, vector<32x6xf32> -> vector<32x6xf32>
    %263 = arith.addf %248, %262 : vector<32x6xf32>
    %c184 = arith.constant 184 : index
    %c0_120 = arith.constant 0 : index
    %264 = vector.load %arg1[%c184, %c0_120] : memref<216x96xf32, #tpu.memory_space<vmem>>, vector<32x32xf32>
    %c184_121 = arith.constant 184 : index
    %c0_122 = arith.constant 0 : index
    %265 = vector.load %arg2[%c184_121, %c0_122] : memref<216x1xf32, #tpu.memory_space<vmem>>, vector<32x1xf32>
    %cst_123 = arith.constant dense<0.000000e+00> : vector<32x2xf32>
    %266 = tpu.matmul %264, %232, %cst_123 {dimension_numbers = #tpu.dot_dimension_numbers<[1], [0], [0], [1], [0, 0, 1, 1], [], []>} : vector<32x32xf32>, vector<32x2xf32>, vector<32x2xf32> -> vector<32x2xf32>
    %267 = vector.broadcast %265 : vector<32x1xf32> to vector<32x2xf32>
    %268 = arith.addf %266, %267 : vector<32x2xf32>
    %c3_i32_124 = arith.constant 3 : i32
    %269 = vector.broadcast %c3_i32_124 : i32 to vector<2x6xi32>
    %270 = arith.muli %233, %269 : vector<2x6xi32>
    %c2_i32_125 = arith.constant 2 : i32
    %271 = vector.broadcast %c2_i32_125 : i32 to vector<2x6xi32>
    %272 = arith.addi %270, %271 : vector<2x6xi32>
    %273 = arith.cmpi eq, %234, %272 : vector<2x6xi32>
    %cst_126 = arith.constant 1.000000e+00 : f32
    %cst_127 = arith.constant 0.000000e+00 : f32
    %274 = vector.broadcast %cst_126 : f32 to vector<2x6xf32>
    %275 = vector.broadcast %cst_127 : f32 to vector<2x6xf32>
    %276 = arith.select %273, %274, %275 : vector<2x6xi1>, vector<2x6xf32>
    %cst_128 = arith.constant dense<0.000000e+00> : vector<32x6xf32>
    %277 = tpu.matmul %268, %276, %cst_128 {dimension_numbers = #tpu.dot_dimension_numbers<[1], [0], [0], [1], [0, 0, 1, 1], [], []>} : vector<32x2xf32>, vector<2x6xf32>, vector<32x6xf32> -> vector<32x6xf32>
    %278 = arith.addf %263, %277 : vector<32x6xf32>
    %cst_129 = arith.constant 0.000000e+00 : f32
    %279 = vector.broadcast %cst_129 : f32 to vector<32x1xf32>
    %280 = vector.extract_strided_slice %278 {offsets = [0, 0], sizes = [32, 5], strides = [1, 1]} : vector<32x6xf32> to vector<32x5xf32>
    %281 = tpu.concatenate %279, %280 in 1 : vector<32x1xf32>, vector<32x5xf32> -> vector<32x6xf32>
    %282 = vector.extract_strided_slice %278 {offsets = [0, 1], sizes = [32, 5], strides = [1, 1]} : vector<32x6xf32> to vector<32x5xf32>
    %283 = tpu.concatenate %282, %279 in 1 : vector<32x5xf32>, vector<32x1xf32> -> vector<32x6xf32>
    %284 = tpu.iota {dimensions = array<i32: 1>} : vector<32x6xi32>
    %c3_i32_130 = arith.constant 3 : i32
    %285 = vector.broadcast %c3_i32_130 : i32 to vector<32x6xi32>
    %286 = arith.cmpi eq, %284, %285 : vector<32x6xi32>
    %cst_131 = arith.constant 0.000000e+00 : f32
    %287 = vector.broadcast %cst_131 : f32 to vector<32x6xf32>
    %288 = arith.select %286, %287, %281 : vector<32x6xi1>, vector<32x6xf32>
    %c2_i32_132 = arith.constant 2 : i32
    %289 = vector.broadcast %c2_i32_132 : i32 to vector<32x6xi32>
    %290 = arith.cmpi eq, %284, %289 : vector<32x6xi32>
    %cst_133 = arith.constant 0.000000e+00 : f32
    %291 = vector.broadcast %cst_133 : f32 to vector<32x6xf32>
    %292 = arith.select %290, %291, %283 : vector<32x6xi1>, vector<32x6xf32>
    %c56 = arith.constant 56 : index
    %c0_134 = arith.constant 0 : index
    %293 = vector.load %arg1[%c56, %c0_134] : memref<216x96xf32, #tpu.memory_space<vmem>>, vector<16x32xf32>
    %c56_135 = arith.constant 56 : index
    %c32_136 = arith.constant 32 : index
    %294 = vector.load %arg1[%c56_135, %c32_136] : memref<216x96xf32, #tpu.memory_space<vmem>>, vector<16x32xf32>
    %c56_137 = arith.constant 56 : index
    %c64_138 = arith.constant 64 : index
    %295 = vector.load %arg1[%c56_137, %c64_138] : memref<216x96xf32, #tpu.memory_space<vmem>>, vector<16x32xf32>
    %c56_139 = arith.constant 56 : index
    %c0_140 = arith.constant 0 : index
    %296 = vector.load %arg2[%c56_139, %c0_140] : memref<216x1xf32, #tpu.memory_space<vmem>>, vector<16x1xf32>
    %cst_141 = arith.constant dense<0.000000e+00> : vector<16x6xf32>
    %297 = tpu.matmul %293, %288, %cst_141 {dimension_numbers = #tpu.dot_dimension_numbers<[1], [0], [0], [1], [0, 0, 1, 1], [], []>} : vector<16x32xf32>, vector<32x6xf32>, vector<16x6xf32> -> vector<16x6xf32>
    %cst_142 = arith.constant dense<0.000000e+00> : vector<16x6xf32>
    %298 = tpu.matmul %294, %278, %cst_142 {dimension_numbers = #tpu.dot_dimension_numbers<[1], [0], [0], [1], [0, 0, 1, 1], [], []>} : vector<16x32xf32>, vector<32x6xf32>, vector<16x6xf32> -> vector<16x6xf32>
    %299 = arith.addf %297, %298 : vector<16x6xf32>
    %cst_143 = arith.constant dense<0.000000e+00> : vector<16x6xf32>
    %300 = tpu.matmul %295, %292, %cst_143 {dimension_numbers = #tpu.dot_dimension_numbers<[1], [0], [0], [1], [0, 0, 1, 1], [], []>} : vector<16x32xf32>, vector<32x6xf32>, vector<16x6xf32> -> vector<16x6xf32>
    %301 = arith.addf %299, %300 : vector<16x6xf32>
    %302 = vector.broadcast %296 : vector<16x1xf32> to vector<16x6xf32>
    %303 = arith.addf %301, %302 : vector<16x6xf32>
    %cst_144 = arith.constant 0.000000e+00 : f32
    %304 = vector.broadcast %cst_144 : f32 to vector<16x6xf32>
    %305 = arith.maximumf %303, %304 : vector<16x6xf32>
    %306 = tpu.iota {dimensions = array<i32: 0>} : vector<6x14xi32>
    %307 = tpu.iota {dimensions = array<i32: 1>} : vector<6x14xi32>
    %c0_i32_145 = arith.constant 0 : i32
    %308 = vector.broadcast %c0_i32_145 : i32 to vector<6x14xi32>
    %309 = arith.subi %306, %308 : vector<6x14xi32>
    %c0_i32_146 = arith.constant 0 : i32
    %310 = vector.broadcast %c0_i32_146 : i32 to vector<6x14xi32>
    %311 = arith.subi %307, %310 : vector<6x14xi32>
    %c0_i32_147 = arith.constant 0 : i32
    %312 = vector.broadcast %c0_i32_147 : i32 to vector<6x14xi32>
    %313 = arith.cmpi sge, %307, %312 : vector<6x14xi32>
    %c7_i32_148 = arith.constant 7 : i32
    %314 = vector.broadcast %c7_i32_148 : i32 to vector<6x14xi32>
    %315 = arith.cmpi slt, %307, %314 : vector<6x14xi32>
    %316 = arith.andi %313, %315 : vector<6x14xi1>
    %c0_i32_149 = arith.constant 0 : i32
    %317 = vector.broadcast %c0_i32_149 : i32 to vector<6x14xi32>
    %318 = arith.cmpi sge, %309, %317 : vector<6x14xi32>
    %319 = arith.andi %316, %318 : vector<6x14xi1>
    %c3_i32_150 = arith.constant 3 : i32
    %320 = vector.broadcast %c3_i32_150 : i32 to vector<6x14xi32>
    %321 = arith.cmpi slt, %309, %320 : vector<6x14xi32>
    %322 = arith.andi %319, %321 : vector<6x14xi1>
    %c7_i32_151 = arith.constant 7 : i32
    %323 = vector.broadcast %c7_i32_151 : i32 to vector<6x14xi32>
    %324 = arith.muli %309, %323 : vector<6x14xi32>
    %c3_i32_152 = arith.constant 3 : i32
    %325 = vector.broadcast %c3_i32_152 : i32 to vector<6x14xi32>
    %326 = arith.muli %311, %325 : vector<6x14xi32>
    %327 = arith.cmpi sle, %324, %326 : vector<6x14xi32>
    %328 = arith.andi %322, %327 : vector<6x14xi1>
    %c3_i32_153 = arith.constant 3 : i32
    %329 = vector.broadcast %c3_i32_153 : i32 to vector<6x14xi32>
    %330 = arith.muli %311, %329 : vector<6x14xi32>
    %c1_i32_154 = arith.constant 1 : i32
    %331 = vector.broadcast %c1_i32_154 : i32 to vector<6x14xi32>
    %332 = arith.addi %309, %331 : vector<6x14xi32>
    %c7_i32_155 = arith.constant 7 : i32
    %333 = vector.broadcast %c7_i32_155 : i32 to vector<6x14xi32>
    %334 = arith.muli %332, %333 : vector<6x14xi32>
    %335 = arith.cmpi slt, %330, %334 : vector<6x14xi32>
    %336 = arith.andi %328, %335 : vector<6x14xi1>
    %c3_i32_156 = arith.constant 3 : i32
    %337 = vector.broadcast %c3_i32_156 : i32 to vector<6x14xi32>
    %338 = arith.subi %306, %337 : vector<6x14xi32>
    %c7_i32_157 = arith.constant 7 : i32
    %339 = vector.broadcast %c7_i32_157 : i32 to vector<6x14xi32>
    %340 = arith.subi %307, %339 : vector<6x14xi32>
    %c7_i32_158 = arith.constant 7 : i32
    %341 = vector.broadcast %c7_i32_158 : i32 to vector<6x14xi32>
    %342 = arith.cmpi sge, %307, %341 : vector<6x14xi32>
    %c14_i32_159 = arith.constant 14 : i32
    %343 = vector.broadcast %c14_i32_159 : i32 to vector<6x14xi32>
    %344 = arith.cmpi slt, %307, %343 : vector<6x14xi32>
    %345 = arith.andi %342, %344 : vector<6x14xi1>
    %c0_i32_160 = arith.constant 0 : i32
    %346 = vector.broadcast %c0_i32_160 : i32 to vector<6x14xi32>
    %347 = arith.cmpi sge, %338, %346 : vector<6x14xi32>
    %348 = arith.andi %345, %347 : vector<6x14xi1>
    %c3_i32_161 = arith.constant 3 : i32
    %349 = vector.broadcast %c3_i32_161 : i32 to vector<6x14xi32>
    %350 = arith.cmpi slt, %338, %349 : vector<6x14xi32>
    %351 = arith.andi %348, %350 : vector<6x14xi1>
    %c7_i32_162 = arith.constant 7 : i32
    %352 = vector.broadcast %c7_i32_162 : i32 to vector<6x14xi32>
    %353 = arith.muli %338, %352 : vector<6x14xi32>
    %c3_i32_163 = arith.constant 3 : i32
    %354 = vector.broadcast %c3_i32_163 : i32 to vector<6x14xi32>
    %355 = arith.muli %340, %354 : vector<6x14xi32>
    %356 = arith.cmpi sle, %353, %355 : vector<6x14xi32>
    %357 = arith.andi %351, %356 : vector<6x14xi1>
    %c3_i32_164 = arith.constant 3 : i32
    %358 = vector.broadcast %c3_i32_164 : i32 to vector<6x14xi32>
    %359 = arith.muli %340, %358 : vector<6x14xi32>
    %c1_i32_165 = arith.constant 1 : i32
    %360 = vector.broadcast %c1_i32_165 : i32 to vector<6x14xi32>
    %361 = arith.addi %338, %360 : vector<6x14xi32>
    %c7_i32_166 = arith.constant 7 : i32
    %362 = vector.broadcast %c7_i32_166 : i32 to vector<6x14xi32>
    %363 = arith.muli %361, %362 : vector<6x14xi32>
    %364 = arith.cmpi slt, %359, %363 : vector<6x14xi32>
    %365 = arith.andi %357, %364 : vector<6x14xi1>
    %366 = arith.ori %336, %365 : vector<6x14xi1>
    %cst_167 = arith.constant 1.000000e+00 : f32
    %cst_168 = arith.constant 0.000000e+00 : f32
    %367 = vector.broadcast %cst_167 : f32 to vector<6x14xf32>
    %368 = vector.broadcast %cst_168 : f32 to vector<6x14xf32>
    %369 = arith.select %366, %367, %368 : vector<6x14xi1>, vector<6x14xf32>
    %cst_169 = arith.constant dense<0.000000e+00> : vector<16x14xf32>
    %370 = tpu.matmul %305, %369, %cst_169 {dimension_numbers = #tpu.dot_dimension_numbers<[1], [0], [0], [1], [0, 0, 1, 1], [], []>} : vector<16x6xf32>, vector<6x14xf32>, vector<16x14xf32> -> vector<16x14xf32>
    %cst_170 = arith.constant 0.000000e+00 : f32
    %371 = vector.broadcast %cst_170 : f32 to vector<16x1xf32>
    %372 = vector.extract_strided_slice %370 {offsets = [0, 0], sizes = [16, 13], strides = [1, 1]} : vector<16x14xf32> to vector<16x13xf32>
    %373 = tpu.concatenate %371, %372 in 1 : vector<16x1xf32>, vector<16x13xf32> -> vector<16x14xf32>
    %374 = vector.extract_strided_slice %370 {offsets = [0, 1], sizes = [16, 13], strides = [1, 1]} : vector<16x14xf32> to vector<16x13xf32>
    %375 = tpu.concatenate %374, %371 in 1 : vector<16x13xf32>, vector<16x1xf32> -> vector<16x14xf32>
    %376 = tpu.iota {dimensions = array<i32: 1>} : vector<16x14xi32>
    %c7_i32_171 = arith.constant 7 : i32
    %377 = vector.broadcast %c7_i32_171 : i32 to vector<16x14xi32>
    %378 = arith.cmpi eq, %376, %377 : vector<16x14xi32>
    %cst_172 = arith.constant 0.000000e+00 : f32
    %379 = vector.broadcast %cst_172 : f32 to vector<16x14xf32>
    %380 = arith.select %378, %379, %373 : vector<16x14xi1>, vector<16x14xf32>
    %c6_i32_173 = arith.constant 6 : i32
    %381 = vector.broadcast %c6_i32_173 : i32 to vector<16x14xi32>
    %382 = arith.cmpi eq, %376, %381 : vector<16x14xi32>
    %cst_174 = arith.constant 0.000000e+00 : f32
    %383 = vector.broadcast %cst_174 : f32 to vector<16x14xf32>
    %384 = arith.select %382, %383, %375 : vector<16x14xi1>, vector<16x14xf32>
    %c72 = arith.constant 72 : index
    %c0_175 = arith.constant 0 : index
    %385 = vector.load %arg1[%c72, %c0_175] : memref<216x96xf32, #tpu.memory_space<vmem>>, vector<8x16xf32>
    %c72_176 = arith.constant 72 : index
    %c16_177 = arith.constant 16 : index
    %386 = vector.load %arg1[%c72_176, %c16_177] : memref<216x96xf32, #tpu.memory_space<vmem>>, vector<8x16xf32>
    %c72_178 = arith.constant 72 : index
    %c32_179 = arith.constant 32 : index
    %387 = vector.load %arg1[%c72_178, %c32_179] : memref<216x96xf32, #tpu.memory_space<vmem>>, vector<8x16xf32>
    %c72_180 = arith.constant 72 : index
    %c0_181 = arith.constant 0 : index
    %388 = vector.load %arg2[%c72_180, %c0_181] : memref<216x1xf32, #tpu.memory_space<vmem>>, vector<8x1xf32>
    %cst_182 = arith.constant dense<0.000000e+00> : vector<8x14xf32>
    %389 = tpu.matmul %385, %380, %cst_182 {dimension_numbers = #tpu.dot_dimension_numbers<[1], [0], [0], [1], [0, 0, 1, 1], [], []>} : vector<8x16xf32>, vector<16x14xf32>, vector<8x14xf32> -> vector<8x14xf32>
    %cst_183 = arith.constant dense<0.000000e+00> : vector<8x14xf32>
    %390 = tpu.matmul %386, %370, %cst_183 {dimension_numbers = #tpu.dot_dimension_numbers<[1], [0], [0], [1], [0, 0, 1, 1], [], []>} : vector<8x16xf32>, vector<16x14xf32>, vector<8x14xf32> -> vector<8x14xf32>
    %391 = arith.addf %389, %390 : vector<8x14xf32>
    %cst_184 = arith.constant dense<0.000000e+00> : vector<8x14xf32>
    %392 = tpu.matmul %387, %384, %cst_184 {dimension_numbers = #tpu.dot_dimension_numbers<[1], [0], [0], [1], [0, 0, 1, 1], [], []>} : vector<8x16xf32>, vector<16x14xf32>, vector<8x14xf32> -> vector<8x14xf32>
    %393 = arith.addf %391, %392 : vector<8x14xf32>
    %394 = vector.broadcast %388 : vector<8x1xf32> to vector<8x14xf32>
    %395 = arith.addf %393, %394 : vector<8x14xf32>
    %cst_185 = arith.constant 0.000000e+00 : f32
    %396 = vector.broadcast %cst_185 : f32 to vector<8x14xf32>
    %397 = arith.maximumf %395, %396 : vector<8x14xf32>
    %398 = tpu.iota {dimensions = array<i32: 0>} : vector<14x30xi32>
    %399 = tpu.iota {dimensions = array<i32: 1>} : vector<14x30xi32>
    %c0_i32_186 = arith.constant 0 : i32
    %400 = vector.broadcast %c0_i32_186 : i32 to vector<14x30xi32>
    %401 = arith.subi %398, %400 : vector<14x30xi32>
    %c0_i32_187 = arith.constant 0 : i32
    %402 = vector.broadcast %c0_i32_187 : i32 to vector<14x30xi32>
    %403 = arith.subi %399, %402 : vector<14x30xi32>
    %c0_i32_188 = arith.constant 0 : i32
    %404 = vector.broadcast %c0_i32_188 : i32 to vector<14x30xi32>
    %405 = arith.cmpi sge, %399, %404 : vector<14x30xi32>
    %c15_i32_189 = arith.constant 15 : i32
    %406 = vector.broadcast %c15_i32_189 : i32 to vector<14x30xi32>
    %407 = arith.cmpi slt, %399, %406 : vector<14x30xi32>
    %408 = arith.andi %405, %407 : vector<14x30xi1>
    %c0_i32_190 = arith.constant 0 : i32
    %409 = vector.broadcast %c0_i32_190 : i32 to vector<14x30xi32>
    %410 = arith.cmpi sge, %401, %409 : vector<14x30xi32>
    %411 = arith.andi %408, %410 : vector<14x30xi1>
    %c7_i32_191 = arith.constant 7 : i32
    %412 = vector.broadcast %c7_i32_191 : i32 to vector<14x30xi32>
    %413 = arith.cmpi slt, %401, %412 : vector<14x30xi32>
    %414 = arith.andi %411, %413 : vector<14x30xi1>
    %c15_i32_192 = arith.constant 15 : i32
    %415 = vector.broadcast %c15_i32_192 : i32 to vector<14x30xi32>
    %416 = arith.muli %401, %415 : vector<14x30xi32>
    %c7_i32_193 = arith.constant 7 : i32
    %417 = vector.broadcast %c7_i32_193 : i32 to vector<14x30xi32>
    %418 = arith.muli %403, %417 : vector<14x30xi32>
    %419 = arith.cmpi sle, %416, %418 : vector<14x30xi32>
    %420 = arith.andi %414, %419 : vector<14x30xi1>
    %c7_i32_194 = arith.constant 7 : i32
    %421 = vector.broadcast %c7_i32_194 : i32 to vector<14x30xi32>
    %422 = arith.muli %403, %421 : vector<14x30xi32>
    %c1_i32_195 = arith.constant 1 : i32
    %423 = vector.broadcast %c1_i32_195 : i32 to vector<14x30xi32>
    %424 = arith.addi %401, %423 : vector<14x30xi32>
    %c15_i32_196 = arith.constant 15 : i32
    %425 = vector.broadcast %c15_i32_196 : i32 to vector<14x30xi32>
    %426 = arith.muli %424, %425 : vector<14x30xi32>
    %427 = arith.cmpi slt, %422, %426 : vector<14x30xi32>
    %428 = arith.andi %420, %427 : vector<14x30xi1>
    %c7_i32_197 = arith.constant 7 : i32
    %429 = vector.broadcast %c7_i32_197 : i32 to vector<14x30xi32>
    %430 = arith.subi %398, %429 : vector<14x30xi32>
    %c15_i32_198 = arith.constant 15 : i32
    %431 = vector.broadcast %c15_i32_198 : i32 to vector<14x30xi32>
    %432 = arith.subi %399, %431 : vector<14x30xi32>
    %c15_i32_199 = arith.constant 15 : i32
    %433 = vector.broadcast %c15_i32_199 : i32 to vector<14x30xi32>
    %434 = arith.cmpi sge, %399, %433 : vector<14x30xi32>
    %c30_i32_200 = arith.constant 30 : i32
    %435 = vector.broadcast %c30_i32_200 : i32 to vector<14x30xi32>
    %436 = arith.cmpi slt, %399, %435 : vector<14x30xi32>
    %437 = arith.andi %434, %436 : vector<14x30xi1>
    %c0_i32_201 = arith.constant 0 : i32
    %438 = vector.broadcast %c0_i32_201 : i32 to vector<14x30xi32>
    %439 = arith.cmpi sge, %430, %438 : vector<14x30xi32>
    %440 = arith.andi %437, %439 : vector<14x30xi1>
    %c7_i32_202 = arith.constant 7 : i32
    %441 = vector.broadcast %c7_i32_202 : i32 to vector<14x30xi32>
    %442 = arith.cmpi slt, %430, %441 : vector<14x30xi32>
    %443 = arith.andi %440, %442 : vector<14x30xi1>
    %c15_i32_203 = arith.constant 15 : i32
    %444 = vector.broadcast %c15_i32_203 : i32 to vector<14x30xi32>
    %445 = arith.muli %430, %444 : vector<14x30xi32>
    %c7_i32_204 = arith.constant 7 : i32
    %446 = vector.broadcast %c7_i32_204 : i32 to vector<14x30xi32>
    %447 = arith.muli %432, %446 : vector<14x30xi32>
    %448 = arith.cmpi sle, %445, %447 : vector<14x30xi32>
    %449 = arith.andi %443, %448 : vector<14x30xi1>
    %c7_i32_205 = arith.constant 7 : i32
    %450 = vector.broadcast %c7_i32_205 : i32 to vector<14x30xi32>
    %451 = arith.muli %432, %450 : vector<14x30xi32>
    %c1_i32_206 = arith.constant 1 : i32
    %452 = vector.broadcast %c1_i32_206 : i32 to vector<14x30xi32>
    %453 = arith.addi %430, %452 : vector<14x30xi32>
    %c15_i32_207 = arith.constant 15 : i32
    %454 = vector.broadcast %c15_i32_207 : i32 to vector<14x30xi32>
    %455 = arith.muli %453, %454 : vector<14x30xi32>
    %456 = arith.cmpi slt, %451, %455 : vector<14x30xi32>
    %457 = arith.andi %449, %456 : vector<14x30xi1>
    %458 = arith.ori %428, %457 : vector<14x30xi1>
    %cst_208 = arith.constant 1.000000e+00 : f32
    %cst_209 = arith.constant 0.000000e+00 : f32
    %459 = vector.broadcast %cst_208 : f32 to vector<14x30xf32>
    %460 = vector.broadcast %cst_209 : f32 to vector<14x30xf32>
    %461 = arith.select %458, %459, %460 : vector<14x30xi1>, vector<14x30xf32>
    %cst_210 = arith.constant dense<0.000000e+00> : vector<8x30xf32>
    %462 = tpu.matmul %397, %461, %cst_210 {dimension_numbers = #tpu.dot_dimension_numbers<[1], [0], [0], [1], [0, 0, 1, 1], [], []>} : vector<8x14xf32>, vector<14x30xf32>, vector<8x30xf32> -> vector<8x30xf32>
    %cst_211 = arith.constant 0.000000e+00 : f32
    %463 = vector.broadcast %cst_211 : f32 to vector<8x1xf32>
    %464 = vector.extract_strided_slice %462 {offsets = [0, 0], sizes = [8, 29], strides = [1, 1]} : vector<8x30xf32> to vector<8x29xf32>
    %465 = tpu.concatenate %463, %464 in 1 : vector<8x1xf32>, vector<8x29xf32> -> vector<8x30xf32>
    %466 = vector.extract_strided_slice %462 {offsets = [0, 1], sizes = [8, 29], strides = [1, 1]} : vector<8x30xf32> to vector<8x29xf32>
    %467 = tpu.concatenate %466, %463 in 1 : vector<8x29xf32>, vector<8x1xf32> -> vector<8x30xf32>
    %468 = tpu.iota {dimensions = array<i32: 1>} : vector<8x30xi32>
    %c15_i32_212 = arith.constant 15 : i32
    %469 = vector.broadcast %c15_i32_212 : i32 to vector<8x30xi32>
    %470 = arith.cmpi eq, %468, %469 : vector<8x30xi32>
    %cst_213 = arith.constant 0.000000e+00 : f32
    %471 = vector.broadcast %cst_213 : f32 to vector<8x30xf32>
    %472 = arith.select %470, %471, %465 : vector<8x30xi1>, vector<8x30xf32>
    %c14_i32_214 = arith.constant 14 : i32
    %473 = vector.broadcast %c14_i32_214 : i32 to vector<8x30xi32>
    %474 = arith.cmpi eq, %468, %473 : vector<8x30xi32>
    %cst_215 = arith.constant 0.000000e+00 : f32
    %475 = vector.broadcast %cst_215 : f32 to vector<8x30xf32>
    %476 = arith.select %474, %475, %467 : vector<8x30xi1>, vector<8x30xf32>
    %c80 = arith.constant 80 : index
    %c0_216 = arith.constant 0 : index
    %477 = vector.load %arg1[%c80, %c0_216] : memref<216x96xf32, #tpu.memory_space<vmem>>, vector<4x8xf32>
    %c80_217 = arith.constant 80 : index
    %c8_218 = arith.constant 8 : index
    %478 = vector.load %arg1[%c80_217, %c8_218] : memref<216x96xf32, #tpu.memory_space<vmem>>, vector<4x8xf32>
    %c80_219 = arith.constant 80 : index
    %c16_220 = arith.constant 16 : index
    %479 = vector.load %arg1[%c80_219, %c16_220] : memref<216x96xf32, #tpu.memory_space<vmem>>, vector<4x8xf32>
    %c80_221 = arith.constant 80 : index
    %c0_222 = arith.constant 0 : index
    %480 = vector.load %arg2[%c80_221, %c0_222] : memref<216x1xf32, #tpu.memory_space<vmem>>, vector<4x1xf32>
    %cst_223 = arith.constant dense<0.000000e+00> : vector<4x30xf32>
    %481 = tpu.matmul %477, %472, %cst_223 {dimension_numbers = #tpu.dot_dimension_numbers<[1], [0], [0], [1], [0, 0, 1, 1], [], []>} : vector<4x8xf32>, vector<8x30xf32>, vector<4x30xf32> -> vector<4x30xf32>
    %cst_224 = arith.constant dense<0.000000e+00> : vector<4x30xf32>
    %482 = tpu.matmul %478, %462, %cst_224 {dimension_numbers = #tpu.dot_dimension_numbers<[1], [0], [0], [1], [0, 0, 1, 1], [], []>} : vector<4x8xf32>, vector<8x30xf32>, vector<4x30xf32> -> vector<4x30xf32>
    %483 = arith.addf %481, %482 : vector<4x30xf32>
    %cst_225 = arith.constant dense<0.000000e+00> : vector<4x30xf32>
    %484 = tpu.matmul %479, %476, %cst_225 {dimension_numbers = #tpu.dot_dimension_numbers<[1], [0], [0], [1], [0, 0, 1, 1], [], []>} : vector<4x8xf32>, vector<8x30xf32>, vector<4x30xf32> -> vector<4x30xf32>
    %485 = arith.addf %483, %484 : vector<4x30xf32>
    %486 = vector.broadcast %480 : vector<4x1xf32> to vector<4x30xf32>
    %487 = arith.addf %485, %486 : vector<4x30xf32>
    %cst_226 = arith.constant 0.000000e+00 : f32
    %488 = vector.broadcast %cst_226 : f32 to vector<4x30xf32>
    %489 = arith.maximumf %487, %488 : vector<4x30xf32>
    %490 = tpu.iota {dimensions = array<i32: 0>} : vector<30x60xi32>
    %491 = tpu.iota {dimensions = array<i32: 1>} : vector<30x60xi32>
    %c0_i32_227 = arith.constant 0 : i32
    %492 = vector.broadcast %c0_i32_227 : i32 to vector<30x60xi32>
    %493 = arith.subi %490, %492 : vector<30x60xi32>
    %c0_i32_228 = arith.constant 0 : i32
    %494 = vector.broadcast %c0_i32_228 : i32 to vector<30x60xi32>
    %495 = arith.subi %491, %494 : vector<30x60xi32>
    %c0_i32_229 = arith.constant 0 : i32
    %496 = vector.broadcast %c0_i32_229 : i32 to vector<30x60xi32>
    %497 = arith.cmpi sge, %491, %496 : vector<30x60xi32>
    %c30_i32_230 = arith.constant 30 : i32
    %498 = vector.broadcast %c30_i32_230 : i32 to vector<30x60xi32>
    %499 = arith.cmpi slt, %491, %498 : vector<30x60xi32>
    %500 = arith.andi %497, %499 : vector<30x60xi1>
    %c0_i32_231 = arith.constant 0 : i32
    %501 = vector.broadcast %c0_i32_231 : i32 to vector<30x60xi32>
    %502 = arith.cmpi sge, %493, %501 : vector<30x60xi32>
    %503 = arith.andi %500, %502 : vector<30x60xi1>
    %c15_i32_232 = arith.constant 15 : i32
    %504 = vector.broadcast %c15_i32_232 : i32 to vector<30x60xi32>
    %505 = arith.cmpi slt, %493, %504 : vector<30x60xi32>
    %506 = arith.andi %503, %505 : vector<30x60xi1>
    %c30_i32_233 = arith.constant 30 : i32
    %507 = vector.broadcast %c30_i32_233 : i32 to vector<30x60xi32>
    %508 = arith.muli %493, %507 : vector<30x60xi32>
    %c15_i32_234 = arith.constant 15 : i32
    %509 = vector.broadcast %c15_i32_234 : i32 to vector<30x60xi32>
    %510 = arith.muli %495, %509 : vector<30x60xi32>
    %511 = arith.cmpi sle, %508, %510 : vector<30x60xi32>
    %512 = arith.andi %506, %511 : vector<30x60xi1>
    %c15_i32_235 = arith.constant 15 : i32
    %513 = vector.broadcast %c15_i32_235 : i32 to vector<30x60xi32>
    %514 = arith.muli %495, %513 : vector<30x60xi32>
    %c1_i32_236 = arith.constant 1 : i32
    %515 = vector.broadcast %c1_i32_236 : i32 to vector<30x60xi32>
    %516 = arith.addi %493, %515 : vector<30x60xi32>
    %c30_i32_237 = arith.constant 30 : i32
    %517 = vector.broadcast %c30_i32_237 : i32 to vector<30x60xi32>
    %518 = arith.muli %516, %517 : vector<30x60xi32>
    %519 = arith.cmpi slt, %514, %518 : vector<30x60xi32>
    %520 = arith.andi %512, %519 : vector<30x60xi1>
    %c15_i32_238 = arith.constant 15 : i32
    %521 = vector.broadcast %c15_i32_238 : i32 to vector<30x60xi32>
    %522 = arith.subi %490, %521 : vector<30x60xi32>
    %c30_i32_239 = arith.constant 30 : i32
    %523 = vector.broadcast %c30_i32_239 : i32 to vector<30x60xi32>
    %524 = arith.subi %491, %523 : vector<30x60xi32>
    %c30_i32_240 = arith.constant 30 : i32
    %525 = vector.broadcast %c30_i32_240 : i32 to vector<30x60xi32>
    %526 = arith.cmpi sge, %491, %525 : vector<30x60xi32>
    %c60_i32 = arith.constant 60 : i32
    %527 = vector.broadcast %c60_i32 : i32 to vector<30x60xi32>
    %528 = arith.cmpi slt, %491, %527 : vector<30x60xi32>
    %529 = arith.andi %526, %528 : vector<30x60xi1>
    %c0_i32_241 = arith.constant 0 : i32
    %530 = vector.broadcast %c0_i32_241 : i32 to vector<30x60xi32>
    %531 = arith.cmpi sge, %522, %530 : vector<30x60xi32>
    %532 = arith.andi %529, %531 : vector<30x60xi1>
    %c15_i32_242 = arith.constant 15 : i32
    %533 = vector.broadcast %c15_i32_242 : i32 to vector<30x60xi32>
    %534 = arith.cmpi slt, %522, %533 : vector<30x60xi32>
    %535 = arith.andi %532, %534 : vector<30x60xi1>
    %c30_i32_243 = arith.constant 30 : i32
    %536 = vector.broadcast %c30_i32_243 : i32 to vector<30x60xi32>
    %537 = arith.muli %522, %536 : vector<30x60xi32>
    %c15_i32_244 = arith.constant 15 : i32
    %538 = vector.broadcast %c15_i32_244 : i32 to vector<30x60xi32>
    %539 = arith.muli %524, %538 : vector<30x60xi32>
    %540 = arith.cmpi sle, %537, %539 : vector<30x60xi32>
    %541 = arith.andi %535, %540 : vector<30x60xi1>
    %c15_i32_245 = arith.constant 15 : i32
    %542 = vector.broadcast %c15_i32_245 : i32 to vector<30x60xi32>
    %543 = arith.muli %524, %542 : vector<30x60xi32>
    %c1_i32_246 = arith.constant 1 : i32
    %544 = vector.broadcast %c1_i32_246 : i32 to vector<30x60xi32>
    %545 = arith.addi %522, %544 : vector<30x60xi32>
    %c30_i32_247 = arith.constant 30 : i32
    %546 = vector.broadcast %c30_i32_247 : i32 to vector<30x60xi32>
    %547 = arith.muli %545, %546 : vector<30x60xi32>
    %548 = arith.cmpi slt, %543, %547 : vector<30x60xi32>
    %549 = arith.andi %541, %548 : vector<30x60xi1>
    %550 = arith.ori %520, %549 : vector<30x60xi1>
    %cst_248 = arith.constant 1.000000e+00 : f32
    %cst_249 = arith.constant 0.000000e+00 : f32
    %551 = vector.broadcast %cst_248 : f32 to vector<30x60xf32>
    %552 = vector.broadcast %cst_249 : f32 to vector<30x60xf32>
    %553 = arith.select %550, %551, %552 : vector<30x60xi1>, vector<30x60xf32>
    %cst_250 = arith.constant dense<0.000000e+00> : vector<4x60xf32>
    %554 = tpu.matmul %489, %553, %cst_250 {dimension_numbers = #tpu.dot_dimension_numbers<[1], [0], [0], [1], [0, 0, 1, 1], [], []>} : vector<4x30xf32>, vector<30x60xf32>, vector<4x60xf32> -> vector<4x60xf32>
    %c0_251 = arith.constant 0 : index
    %c0_252 = arith.constant 0 : index
    %555 = vector.load %arg3[%c0_251, %c0_252] : memref<4x60xf32, #tpu.memory_space<vmem>>, vector<4x60xf32>
    tpu.vector_store %arg3[%c0_251, %c0_252], %554 {strides = array<i32>} : memref<4x60xf32, #tpu.memory_space<vmem>>, vector<4x60xf32>,
    return
  }
}

</mosaic_0001>

<bundles_post_ra>
// kernel: cae_forward.1
= control target key start
LH: loop header
LB: loop body
LE: loop exit
PB: predicated region body
PF: predicated region fallthrough
CT: control target
= control target key end

     0   :  { %s2159_s14 = smov 127   ;;  %s2160_s15 = smov 1   ;;  %vm40_vm0 = vcmask 1043456   ;;  %v2163_v3 = vmov 0   ;;  %v26_v4 = vlaneseq  ;;  %vm24_vm1 = vcmask 482304   ;;  %s2899_s0 = inlined_call_operand.vmem [shape: f32[4,60], index: 0, kind: input, shape index: {}]   ;;  %s2900_s1 = inlined_call_operand.vmem [shape: f32[216,96], index: 1, kind: input, shape index: {}]   ;;  %s2901_s2 = inlined_call_operand.vmem [shape: f32[216,1], index: 2, kind: input, shape index: {}]   ;;  %s2902_s3 = inlined_call_operand.vmem [shape: f32[4,60], index: 3, kind: output, shape index: {}]  }
   0x1   :  { %v14_v0 = vld [vmem:[%s2899_s0] sm:$0xf]  ;;  %s2161_s18 = smov 120   ;;  %s2162_s19 = smov 124   ;;  %2156 = vset.pattern.permute.xlu2 %v2163_v3  ;;  %2157 = vset.pattern.permute.xlu0 %v2163_v3  ;;  %vm2908_vm2 = vcmask 7168   ;;  %vm37_vm5 = vcmask 31744  }
   0x2   :  { %21 = vrot.lane.b32.xlu0 %v14_v0, %s2159_s14  ;;  %16 = vrot.lane.b32.xlu1 %v14_v0, %s2160_s15  ;;  %v32_v1 = vld [vmem:[%s2900_s1] sm:$0xff]  ;;  %v2202_v5 = vand.u32 127, %v26_v4  ;;  %v2210_v14 = vshrl.u32 %v26_v4, 7  ;;  %v2921_v21 = vmov 0  ;;  %v2164_v26 = vmov 0.0   ;;  %v237_v43 = vld [vmem:[%s2900_s1 + $0x8] sm:$0xff] }
   0x3   :  { %1969 = vmatpush.msk.msra.mxu0 %vm40_vm0, %v14_v0  ;;  %v33_v2 = vld [vmem:[%s2901_s2] sm:$0xff]  ;;  %2158 = vset.pattern.permute.xlu1 %v2163_v3  ;;  %v2165_v29 = vmov 1.0   ;;  %s2166_s23 = smov 112   ;;  %v238_v44 = vld [vmem:[%s2900_s1 + $0x10] sm:$0xff]  ;;  %v239_v48 = vld [vmem:[%s2901_s2 + $0x8] sm:$0xff]  ;;  %s2167_s7 = smov 96  }
   0x4   :  { %118 = vperm.xlu2 %2156, %v33_v2   ;;  %vm30_vm3 = vcmp.eq.s32.totalorder %v2202_v5, 29  ;;  %vm28_vm4 = vcmp.eq.s32.totalorder %v2202_v5, 30  ;;  %v2213_v15 = vmul.u32 2, %v2202_v5  ;;  %vm158_vm6 = vcmp.ge.s32.totalorder %v2202_v5, 15  ;;  %v240_v49 = vld [vmem:[%s2901_s2 + $0x10] sm:$0xff]  ;;  %s2168_s29 = smov 64  }
   0x5   :  { %vm2903_vm7 = vcmp.lt.s32.totalorder %v2202_v5, 30  ;;  %v2218_v16 = vadd.s32 4294967281, %v2202_v5  ;;  %v137_v17 = vadd.s32 56, %v2210_v14  ;;  %vm2907_vm8 = vcmp.lt.s32.totalorder %v2202_v5, 15 }
   0x6   :  { %v136_v18 = vadd.s32 48, %v2210_v14  ;;  %v135_v19 = vadd.s32 40, %v2210_v14  ;;  %vm2228_vm10 = vmand %vm158_vm6, %vm2903_vm7  ;;  %v134_v25 = vadd.s32 32, %v2210_v14  ;;  %v2255_v28 = vadd.s32 24, %v2210_v14 }
   0x7   :  { %v162_v20 = vmul.u32 2, %v2218_v16  ;;  %vm149_vm9 = vcmp.eq.s32.totalorder %v137_v17, %v2213_v15  ;;  %v2922_v21 = vsel %vm2228_vm10, 4294967295, %v2921_v21  ;;  %v2267_v30 = vadd.s32 16, %v2210_v14 }
   0x8   :  { %vm148_vm11 = vcmp.eq.s32.totalorder %v136_v18, %v2213_v15  ;;  %vm147_vm12 = vcmp.eq.s32.totalorder %v135_v19, %v2213_v15  ;;  %vm157_vm13 = vmand %vm2907_vm8, %vm149_vm9  ;;  %vm146_vm7 = vcmp.eq.s32.totalorder %v134_v25, %v2213_v15  ;;  %v2299_v39 = vadd.s32 8, %v2210_v14 }
   0x9   :  { %v163_v22 = vadd.s32 30, %v162_v20  ;;  %vm2238_vm14 = vmand %vm2907_vm8, %vm148_vm11  ;;  %v2357_v56 = vadd.s32 4294967289, %v2202_v5 }
   0xa   :  { %88 = vrot.lane.b32.xlu0 %v32_v1, %s2161_s18  ;;  %35 = vrot.lane.b32.xlu1 %v32_v1, %s2162_s19 }
   0xb   :  { %vm171_vm15 = vcmp.eq.s32.totalorder %v137_v17, %v163_v22  ;;  %vm169_vm9 = vcmp.eq.s32.totalorder %v135_v19, %v163_v22  ;;  %v371_v57 = vmul.u32 2, %v2357_v56 }
   0xd   :  { %v372_v59 = vadd.s32 15, %v371_v57 }
  0x12   :  { %302 = vrot.lane.b32.xlu1 %v237_v43, %s2166_s23 }
  0x1a   :  { %304 = vrot.lane.b32.xlu1 %v238_v44, %s2166_s23 }
  0x22   :  { %342 = vperm.xlu1 %2158, %v240_v49  }
  0x5e   :  { %v119_v35 = vpop.permute.xlu2 %118 }
  0x74   :  { %v22_v6 = vpop.permute.xlu0 %21  ;;  %v17_v7 = vpop.permute.xlu1 %16 }
  0x75   :  { %v25_v8 = vsel %vm24_vm1, %v22_v6, 0.0  ;;  %v20_v9 = vsel %vm2908_vm2, 0.0, %v17_v7 }
  0x76   :  { %v31_v10 = vsel %vm30_vm3, 0.0, %v25_v8  ;;  %v29_v11 = vsel %vm28_vm4, 0.0, %v20_v9  ;;  %vm170_vm3 = vcmp.eq.s32.totalorder %v136_v18, %v163_v22  ;;  %vm2244_vm4 = vmand %vm2907_vm8, %vm147_vm12 }
  0x77   :  { %1973 = vmatpush.msk.msra.mxu2 %vm40_vm0, %v31_v10  ;;  %1971 = vmatpush.msk.msra.mxu1 %vm40_vm0, %v29_v11  ;;  %vm178_vm11 = vmand %vm2228_vm10, %vm170_vm3 }
  0x78   :  { %1972 = vmatmul.msk.f32.vlgmr.msra.gmra.mxu1 %vm37_vm5, %v32_v1  ;;  %vm186_vm12 = vmor %vm2238_vm14, %vm178_vm11  ;;  %vm145_vm14 = vcmp.eq.s32.totalorder %v2255_v28, %v2213_v15 }
  0x7c   :  { %v89_v12 = vpop.permute.xlu0 %88  ;;  %v36_v13 = vpop.permute.xlu1 %35 }
  0x7d   :  { %1974 = vmatmul.msk.f32.vlgmr.msra.gmra.mxu2 %vm37_vm5, %v89_v12  ;;  %1970 = vmatmul.msk.f32.vlgmr.msra.gmra.mxu0 %vm37_vm5, %v36_v13  ;;  %vm179_vm5 = vmand %vm2228_vm10, %vm171_vm15  ;;  %vm168_vm15 = vcmp.eq.s32.totalorder %v134_v25, %v163_v22  ;;  %v449_v25 = vld [vmem:[%s2900_s1 + $0x20] sm:$0xff] }
  0x7e   :  { %vm187_vm6 = vmor %vm157_vm13, %vm179_vm5 }
  0x7f   :  { %v195_v27 = vsel %vm187_vm6, 1.0, %v2164_v26  ;;  %vm177_vm13 = vmand %vm2228_vm10, %vm169_vm9  ;;  %vm167_vm6 = vcmp.eq.s32.totalorder %v2255_v28, %v163_v22 }
  0x80   :  { %1976 = vmatpush.msk.msra.mxu3 %vm40_vm0, %v195_v27  ;;  %vm185_vm3 = vmor %vm2244_vm4, %vm177_vm13  ;;  %v451_v27 = vld [vmem:[%s2900_s1 + $0x30] sm:$0xff] }
  0x81   :  { %vm154_vm0 = vmand %vm2907_vm8, %vm146_vm7  ;;  %vm144_vm7 = vcmp.eq.s32.totalorder %v2267_v30, %v2213_v15 }
  0x82   :  { %1977 = vmatpush.msk.msra.mxu3 %vm186_vm12, %v2165_v29  ;;  %vm176_vm5 = vmand %vm2228_vm10, %vm168_vm15  ;;  %vm166_vm12 = vcmp.eq.s32.totalorder %v2267_v30, %v163_v22 }
  0x83   :  { %vm184_vm9 = vmor %vm154_vm0, %vm176_vm5  ;;  %vm143_vm5 = vcmp.eq.s32.totalorder %v2299_v39, %v2213_v15 }
  0x84   :  { %1978 = vmatpush.msk.msra.mxu3 %vm185_vm3, %v2165_v29  ;;  %vm153_vm4 = vmand %vm2907_vm8, %vm145_vm14  ;;  %v303_v50 = vpop.permute.xlu1 %302 }
  0x85   :  { %vm175_vm11 = vmand %vm2228_vm10, %vm167_vm6  ;;  %vm165_vm6 = vcmp.eq.s32.totalorder %v2299_v39, %v163_v22 }
  0x86   :  { %1979 = vmatpush.msk.msra.mxu3 %vm184_vm9, %v2165_v29  ;;  %vm183_vm13 = vmor %vm153_vm4, %vm175_vm11  ;;  %vm142_vm11 = vcmp.eq.s32.totalorder %v2210_v14, %v2213_v15 }
  0x87   :  { %vm152_vm15 = vmand %vm2907_vm8, %vm144_vm7 }
  0x88   :  { %1980 = vmatpush.msk.msra.mxu3 %vm183_vm13, %v2165_v29  ;;  %vm174_vm3 = vmand %vm2228_vm10, %vm166_vm12  ;;  %vm164_vm13 = vcmp.eq.s32.totalorder %v2210_v14, %v163_v22 }
  0x89   :  { %vm182_vm0 = vmor %vm152_vm15, %vm174_vm3 }
  0x8a   :  { %1981 = vmatpush.msk.msra.mxu3 %vm182_vm0, %v2165_v29  ;;  %vm151_vm9 = vmand %vm2907_vm8, %vm143_vm5 }
  0x8b   :  { %vm173_vm4 = vmand %vm2228_vm10, %vm165_vm6  ;;  %vm196_vm6 = vcmask 490496  }
  0x8c   :  { %vm181_vm12 = vmor %vm151_vm9, %vm173_vm4  ;;  %vm2905_vm9 = vcmask 64512   ;;  %vm2910_vm4 = vcmask 236544   ;;  %v305_v54 = vpop.permute.xlu1 %304 }
  0x8d   :  { %1982 = vmatpush.msk.msra.mxu3 %vm181_vm12, %v2165_v29  ;;  %vm150_vm15 = vmand %vm2907_vm8, %vm142_vm11  ;;  %vm2906_vm12 = vcmp.ne.s32.totalorder %v2202_v5, 14 }
  0x8e   :  { %vm172_vm3 = vmand %vm2228_vm10, %vm164_vm13  ;;  %vm367_vm13 = vcmp.ge.s32.totalorder %v2202_v5, 7 }
  0x8f   :  { %vm180_vm0 = vmor %vm150_vm15, %vm172_vm3  ;;  %vm368_vm15 = vcmp.lt.s32.totalorder %v2202_v5, 14  ;;  %vm2914_vm3 = vcmp.lt.s32.totalorder %v2202_v5, 7 }
  0x90   :  { %1983 = vmatpush.msk.msra.mxu3 %vm180_vm0, %v2165_v29  ;;  %vm2363_vm0 = vmand %vm367_vm13, %vm368_vm15  ;;  %vm375_vm13 = vcmp.eq.s32.totalorder %v2267_v30, %v372_v59 }
  0x94   :  { %v343_v10 = vpop.permute.xlu1 %342 }
  0xf5   :  { %v85_v32 = vpop.f32.mrf.mxu1 }
  0xfa   :  { %v60_v31 = vpop.f32.mrf.mxu0 }
  0xfb   :  { %v86_v33 = vadd.f32 %v85_v32, %v60_v31  ;;  %v453_v31 = vld [vmem:[%s2901_s2 + $0x20] sm:$0xff] }
 0x100   :  { %v112_v34 = vpop.f32.mrf.mxu2 }
 0x101   :  { %v115_v36 = vadd.f32 %v112_v34, %v86_v33  ;;  %v448_v33 = vld [vmem:[%s2900_s1 + $0x18] sm:$0xff]  ;;  %v450_v34 = vld [vmem:[%s2900_s1 + $0x28] sm:$0xff] }
 0x103   :  { %v121_v37 = vadd.f32 %v119_v35, %v115_v36  ;;  %v454_v35 = vld [vmem:[%s2901_s2 + $0x28] sm:$0xff]  ;;  %v452_v36 = vld [vmem:[%s2901_s2 + $0x18] sm:$0xff] }
 0x105   :  { %v122_v38 = vmax.f32 %v121_v37, 0.0  ;;  %v455_v37 = vld [vmem:[%s2901_s2 + $0x30] sm:$0xff] }
 0x107   :  { %124 = vrot.lane.b32.xlu2 %v122_v38, %s2159_s14 }
 0x161   :  { %v125_v40 = vpop.permute.xlu2 %124 }
 0x162   :  { %v127_v41 = vsel %vm24_vm1, %v125_v40, 0.0  ;;  %vm2904_vm1 = vcmp.ne.s32.totalorder %v2202_v5, 15 }
 0x163   :  { %v128_v42 = vmax.f32 %v122_v38, %v127_v41 }
 0x165   :  { %1984 = vmatmul.msk.f32.vlgmr.msra.gmra.mxu3 %vm196_vm6, %v128_v42  ;;  %vm366_vm6 = vmand %vm2914_vm3, %vm145_vm14 }
 0x166   :  { %vm379_vm14 = vmand %vm2363_vm0, %vm375_vm13 }
 0x1e8   :  { %v220_v45 = vpop.f32.mrf.mxu3 }
 0x1e9   :  { %224 = vrot.lane.b32.xlu2 %v220_v45, %s2160_s15  ;;  %228 = vrot.lane.b32.xlu0 %v220_v45, %s2159_s14 }
 0x1ea   :  { %267 = vmatpush.msrb.mxu0 %v220_v45 }
 0x1f1   :  { %243 = vrot.lane.b32.xlu0 %v237_v43, %s2161_s18  ;;  %245 = vrot.lane.b32.xlu2 %v238_v44, %s2161_s18 }
 0x1f9   :  { %337 = vperm.xlu0 %2157, %v239_v48  }
 0x243   :  { %v225_v46 = vpop.permute.xlu2 %224 }
 0x244   :  { %v227_v47 = vsel %vm2908_vm2, 0.0, %v225_v46 }
 0x245   :  { %1988 = vmatpush.msk.msrb.mxu1 %vm2904_vm1, %v227_v47  ;;  %vm376_vm1 = vcmp.eq.s32.totalorder %v2255_v28, %v372_v59 }
 0x246   :  { %1989 = vmatmul.msk.f32.vlgmr.msrb.gmra.mxu1 %vm2905_vm9, %v237_v43  ;;  %vm380_vm15 = vmand %vm2363_vm0, %vm376_vm1  ;;  %vm373_vm1 = vcmp.eq.s32.totalorder %v2210_v14, %v372_v59 }
 0x247   :  { %vm384_vm8 = vmor %vm366_vm6, %vm380_vm15 }
 0x248   :  { %v388_v60 = vsel %vm384_vm8, 1.0, %v2164_v26  ;;  %vm364_vm8 = vmand %vm2914_vm3, %vm143_vm5 }
 0x249   :  { %vm363_vm6 = vmand %vm2914_vm3, %vm142_vm11 }
 0x24a   :  { %vm377_vm13 = vmand %vm2363_vm0, %vm373_vm1  ;;  %vm2913_vm1 = vcmp.ne.s32.totalorder %v2202_v5, 7 }
 0x24b   :  { %v246_v55 = vpop.permute.xlu2 %245  ;;  %vm381_vm15 = vmor %vm363_vm6, %vm377_vm13  ;;  %vm644_vm13 = vcmp.lt.s32.totalorder %v2202_v5, 3 }
 0x24e   :  { %1990 = vmatmul.msk.f32.gmra.mxu1 %vm2905_vm9, %v238_v44 }
 0x25b   :  { %v229_v51 = vpop.permute.xlu0 %228 }
 0x25c   :  { %v232_v52 = vsel %vm2910_vm4, %v229_v51, 0.0 }
 0x25d   :  { %1992 = vmatpush.msk.msrb.mxu2 %vm2906_vm12, %v232_v52  ;;  %vm2918_vm12 = vcmask 1045504  }
 0x25e   :  { %1993 = vmatmul.msk.f32.vlgmr.msrb.gmra.mxu2 %vm2905_vm9, %v303_v50  ;;  %1996 = vmatpush.msk.msrb.mxu3 %vm2918_vm12, %v388_v60 }
 0x263   :  { %v244_v53 = vpop.permute.xlu0 %243 }
 0x264   :  { %1985 = vmatmul.msk.f32.vlgmr.msrb.gmra.mxu0 %vm2905_vm9, %v244_v53 }
 0x266   :  { %1994 = vmatmul.msk.f32.gmra.mxu2 %vm2905_vm9, %v305_v54 }
 0x26b   :  { %v338_v1 = vpop.permute.xlu0 %337 }
 0x26c   :  { %1986 = vmatmul.msk.f32.gmra.mxu0 %vm2905_vm9, %v246_v55  ;;  %vm365_vm9 = vmand %vm2914_vm3, %vm144_vm7 }
 0x26d   :  { %vm383_vm2 = vmor %vm365_vm9, %vm379_vm14  ;;  %vm2909_vm14 = vcmask 244736  }
 0x26e   :  { %1997 = vmatpush.msk.msrb.mxu3 %vm383_vm2, %v2165_v29  ;;  %vm374_vm2 = vcmp.eq.s32.totalorder %v2299_v39, %v372_v59 }
 0x26f   :  { %vm378_vm7 = vmand %vm2363_vm0, %vm374_vm2  ;;  %vm2911_vm2 = vcmp.ne.s32.totalorder %v2202_v5, 6 }
 0x270   :  { %vm382_vm9 = vmor %vm364_vm8, %vm378_vm7  ;;  %vm2916_vm8 = vcmask 105472   ;;  %vm2912_vm7 = vcmask 130048  }
 0x271   :  { %1998 = vmatpush.msk.msrb.mxu3 %vm382_vm9, %v2165_v29  ;;  %vm2929_vm9 = vcmask 7168  }
 0x272   :  { %vm2930_vm6 = vmmov %vm2929_vm9 }
 0x273   :  { %1999 = vmatpush.msk.msrb.mxu3 %vm381_vm15, %v2165_v29  ;;  %vm647_vm15 = vmand %vm644_vm13, %vm143_vm5 }
 0x274   :  { %vm646_vm5 = vmand %vm644_vm13, %vm142_vm11  ;;  %vm1150_vm13 = vcmask 1041408  }
 0x2c3   :  { %v296_v61 = vpop.f32.mrf.mxu1 }
 0x2cb   :  { %v299_v4 = vpop.f32.mrf.mxu1 }
 0x2e1   :  { %v269_v62 = vpop.f32.mrf.mxu0  ;;  %v327_v63 = vpop.f32.mrf.mxu2 }
 0x2e2   :  { %v297_v0 = vadd.f32 %v296_v61, %v269_v62 }
 0x2e4   :  { %v333_v2 = vadd.f32 %v327_v63, %v297_v0 }
 0x2e6   :  { %v345_v3 = vadd.f32 %v338_v1, %v333_v2 }
 0x2e8   :  { %v347_v6 = vmax.f32 %v345_v3, 0.0 }
 0x2e9   :  { %v272_v7 = vpop.f32.mrf.mxu0  ;;  %v330_v8 = vpop.f32.mrf.mxu2 }
 0x2ea   :  { %v300_v9 = vadd.f32 %v299_v4, %v272_v7  ;;  %351 = vrot.lane.b32.xlu2 %v347_v6, %s2159_s14 }
 0x2ec   :  { %v334_v11 = vadd.f32 %v330_v8, %v300_v9 }
 0x2ee   :  { %v346_v12 = vadd.f32 %v343_v10, %v334_v11 }
 0x2f0   :  { %v348_v13 = vmax.f32 %v346_v12, 0.0 }
 0x2f2   :  { %353 = vrot.lane.b32.xlu1 %v348_v13, %s2159_s14 }
 0x344   :  { %v352_v17 = vpop.permute.xlu2 %351 }
 0x345   :  { %v357_v18 = vsel %vm2910_vm4, %v352_v17, 0.0 }
 0x346   :  { %v359_v19 = vmax.f32 %v347_v6, %v357_v18 }
 0x348   :  { %2000 = vmatmul.msk.f32.vlgmr.msrb.gmra.mxu3 %vm2909_vm14, %v359_v19 }
 0x364   :  { %v354_v20 = vpop.permute.xlu1 %353 }
 0x365   :  { %v358_v22 = vsel %vm2910_vm4, %v354_v20, 0.0 }
 0x366   :  { %v360_v23 = vmax.f32 %v348_v13, %v358_v22  ;;  %v2489_v22 = vld [vmem:[%s2900_s1 + $0x58] sm:$0xff] }
 0x368   :  { %2001 = vmatmul.msk.f32.gmra.mxu3 %vm2909_vm14, %v360_v23 }
 0x3cb   :  { %v417_v24 = vpop.f32.mrf.mxu3 }
 0x3cc   :  { %433 = vrot.lane.b32.xlu0 %v417_v24, %s2159_s14 }
 0x3d4   :  { %425 = vrot.lane.b32.xlu0 %v417_v24, %s2160_s15 }
 0x3dc   :  { %462 = vrot.lane.b32.xlu0 %v449_v25, %s2166_s23 }
 0x3e4   :  { %549 = vrot.lane.b32.xlu0 %v451_v27, %s2167_s7 }
 0x3eb   :  { %v420_v32 = vpop.f32.mrf.mxu3 }
 0x3ec   :  { %599 = vperm.xlu0 %2157, %v453_v31   ;;  %427 = vrot.lane.b32.xlu1 %v420_v32, %s2160_s15 }
 0x3ed   :  { %435 = vrot.lane.b32.xlu2 %v420_v32, %s2159_s14  ;;  %491 = vmatpush.msra.mxu0 %v420_v32 }
 0x3ef   :  { %492 = vmatpush.msra.mxu0 %v417_v24 }
 0x3f4   :  { %460 = vrot.lane.b32.xlu1 %v448_v33, %s2166_s23 }
 0x3f5   :  { %543 = vrot.lane.b32.xlu2 %v448_v33, %s2167_s7 }
 0x3fc   :  { %547 = vrot.lane.b32.xlu1 %v450_v34, %s2167_s7 }
 0x3fd   :  { %545 = vrot.lane.b32.xlu2 %v449_v25, %s2167_s7 }
 0x404   :  { %466 = vrot.lane.b32.xlu1 %v451_v27, %s2166_s23 }
 0x405   :  { %464 = vrot.lane.b32.xlu2 %v450_v34, %s2166_s23 }
 0x40c   :  { %604 = vperm.xlu1 %2158, %v454_v35   ;;  %v2507_v35 = vld [vmem:[%s2900_s1 + $0x60] sm:$0xff] }
 0x40d   :  { %594 = vperm.xlu2 %2156, %v452_v36  }
 0x415   :  { %609 = vperm.xlu2 %2156, %v455_v37   ;;  %v967_v37 = vld [vmem:[%s2901_s2 + $0x68] sm:$0xff] }
 0x43e   :  { %v434_v38 = vpop.permute.xlu0 %433 }
 0x43f   :  { %v440_v42 = vsel %vm2916_vm8, %v434_v38, 0.0  ;;  %v2529_v38 = vld [vmem:[%s2900_s1 + $0x70] sm:$0xff] }
 0x446   :  { %v426_v45 = vpop.permute.xlu0 %425 }
 0x447   :  { %v436_v40 = vpop.permute.xlu2 %435  ;;  %v431_v48 = vsel %vm2930_vm6, 0.0, %v426_v45  ;;  %v965_v45 = vld [vmem:[%s2901_s2 + $0x58] sm:$0xff]  ;;  %vm649_vm6 = vcmp.lt.s32.totalorder %v2202_v5, 6 }
 0x448   :  { %v441_v41 = vsel %vm2916_vm8, %v436_v40, 0.0  ;;  %v1231_v40 = vld [vmem:[%s2901_s2 + $0xb8] sm:$0xff] }
 0x449   :  { %2015 = vmatpush.msk.msra.mxu2 %vm2911_vm2, %v441_v41  ;;  %v966_v41 = vld [vmem:[%s2901_s2 + $0x60] sm:$0xff] }
 0x44b   :  { %2017 = vmatpush.msk.msra.mxu2 %vm2911_vm2, %v440_v42  ;;  %v968_v42 = vld [vmem:[%s2901_s2 + $0x70] sm:$0xff] }
 0x44e   :  { %v463_v50 = vpop.permute.xlu0 %462 }
 0x44f   :  { %v544_v43 = vpop.permute.xlu2 %543 }
 0x450   :  { %2018 = vmatmul.msk.f32.vlgmr.msra.gmra.mxu2 %vm2912_vm7, %v544_v43  ;;  %v1232_v43 = vld [vmem:[%s2901_s2 + $0xc0] sm:$0xff] }
 0x456   :  { %v550_v52 = vpop.permute.xlu0 %549 }
 0x457   :  { %v546_v44 = vpop.permute.xlu2 %545 }
 0x458   :  { %2019 = vmatmul.msk.f32.gmra.mxu2 %vm2912_vm7, %v546_v44  ;;  %v997_v44 = vld [vmem:[%s2901_s2 + $0x78] sm:$0xff] }
 0x45e   :  { %v428_v46 = vpop.permute.xlu1 %427  ;;  %v600_v7 = vpop.permute.xlu0 %599 }
 0x45f   :  { %v432_v47 = vsel %vm2929_vm9, 0.0, %v428_v46  ;;  %v465_v53 = vpop.permute.xlu2 %464  ;;  %v1233_v46 = vld [vmem:[%s2901_s2 + $0xc8] sm:$0xff]  ;;  %vm648_vm9 = vcmp.ge.s32.totalorder %v2202_v5, 3 }
 0x460   :  { %2007 = vmatpush.msk.msra.mxu1 %vm2913_vm1, %v432_v47  ;;  %v998_v47 = vld [vmem:[%s2901_s2 + $0x80] sm:$0xff]  ;;  %vm650_vm14 = vmand %vm648_vm9, %vm649_vm6 }
 0x462   :  { %2009 = vmatpush.msk.msra.mxu1 %vm2913_vm1, %v431_v48  ;;  %v1069_v48 = vld [vmem:[%s2901_s2 + $0x98] sm:$0xff] }
 0x463   :  { %2010 = vmatmul.msk.f32.vlgmr.msra.gmra.mxu1 %vm2912_vm7, %v448_v33 }
 0x466   :  { %v461_v49 = vpop.permute.xlu1 %460 }
 0x467   :  { %2002 = vmatmul.msk.f32.vlgmr.msra.gmra.mxu0 %vm2912_vm7, %v461_v49  ;;  %v595_v61 = vpop.permute.xlu2 %594  ;;  %v1234_v49 = vld [vmem:[%s2901_s2 + $0xd0] sm:$0xff] }
 0x46b   :  { %2011 = vmatmul.msk.f32.gmra.mxu1 %vm2912_vm7, %v449_v25 }
 0x46e   :  { %v548_v51 = vpop.permute.xlu1 %547 }
 0x46f   :  { %2003 = vmatmul.msk.f32.gmra.mxu0 %vm2912_vm7, %v463_v50  ;;  %2020 = vmatmul.msk.f32.gmra.mxu2 %vm2912_vm7, %v548_v51  ;;  %v610_v32 = vpop.permute.xlu2 %609  ;;  %v999_v50 = vld [vmem:[%s2901_s2 + $0x88] sm:$0xff]  ;;  %v1070_v51 = vld [vmem:[%s2901_s2 + $0xa0] sm:$0xff] }
 0x473   :  { %2012 = vmatmul.msk.f32.gmra.mxu1 %vm2912_vm7, %v450_v34  ;;  %v2502_v34 = vld [vmem:[%s2900_s1 + $0x68] sm:$0xff] }
 0x476   :  { %v467_v54 = vpop.permute.xlu1 %466 }
 0x477   :  { %2004 = vmatmul.msk.f32.gmra.mxu0 %vm2912_vm7, %v465_v53  ;;  %2021 = vmatmul.msk.f32.gmra.mxu2 %vm2912_vm7, %v550_v52  ;;  %v2022_v52 = vadd.s32 4294967293, %v2202_v5 }
 0x479   :  { %v652_v53 = vmul.u32 2, %v2022_v52 }
 0x47b   :  { %2013 = vmatmul.msk.f32.gmra.mxu1 %vm2912_vm7, %v451_v27 }
 0x47e   :  { %v605_v18 = vpop.permute.xlu1 %604 }
 0x47f   :  { %2005 = vmatmul.msk.f32.gmra.mxu0 %vm2912_vm7, %v467_v54  ;;  %v1000_v54 = vld [vmem:[%s2901_s2 + $0x90] sm:$0xff] }
 0x4d3   :  { %v576_v55 = vpop.f32.mrf.mxu2 }
 0x4db   :  { %v579_v0 = vpop.f32.mrf.mxu2 }
 0x4e0   :  { %v531_v57 = vpop.f32.mrf.mxu1 }
 0x4e4   :  { %v494_v59 = vpop.f32.mrf.mxu0 }
 0x4e5   :  { %v532_v60 = vadd.f32 %v531_v57, %v494_v59  ;;  %v653_v57 = vadd.s32 7, %v652_v53 }
 0x4e7   :  { %v588_v62 = vadd.f32 %v576_v55, %v532_v60  ;;  %v1071_v55 = vld [vmem:[%s2901_s2 + $0xa8] sm:$0xff]  ;;  %vm655_vm4 = vcmp.eq.s32.totalorder %v2299_v39, %v653_v57  ;;  %vm654_vm1 = vcmp.eq.s32.totalorder %v2210_v14, %v653_v57  ;;  %v1072_v60 = vld [vmem:[%s2901_s2 + $0xb0] sm:$0xff] }
 0x4e8   :  { %v534_v63 = vpop.f32.mrf.mxu1  ;;  %vm657_vm2 = vmand %vm650_vm14, %vm655_vm4  ;;  %vm2915_vm4 = vcmask 113664  }
 0x4e9   :  { %v2472_v1 = vadd.f32 %v595_v61, %v588_v62  ;;  %vm659_vm7 = vmor %vm647_vm15, %vm657_vm2  ;;  %vm2917_vm2 = vcmask 48128  }
 0x4ea   :  { %v661_v59 = vsel %vm659_vm7, 1.0, %v2164_v26  ;;  %vm656_vm3 = vmand %vm650_vm14, %vm654_vm1  ;;  %vm806_vm7 = vcmask 261120  }
 0x4eb   :  { %v616_v2 = vmax.f32 %v2472_v1, 0.0  ;;  %2023 = vmatpush.msk.msra.mxu3 %vm2918_vm12, %v661_v59  ;;  %vm658_vm9 = vmor %vm646_vm5, %vm656_vm3  ;;  %vm1137_vm5 = vcmask 15360  }
 0x4ec   :  { %v497_v3 = vpop.f32.mrf.mxu0 }
 0x4ed   :  { %v535_v4 = vadd.f32 %v534_v63, %v497_v3  ;;  %624 = vrot.lane.b32.xlu0 %v616_v2, %s2159_s14  ;;  %2024 = vmatpush.msk.msra.mxu3 %vm658_vm9, %v2165_v29  ;;  %vm2144_vm9 = vcmp.ne.s32.totalorder %v2202_v5, 3 }
 0x4ef   :  { %v589_v6 = vadd.f32 %v579_v0, %v535_v4 }
 0x4f0   :  { %v537_v8 = vpop.f32.mrf.mxu1 }
 0x4f1   :  { %v2478_v9 = vadd.f32 %v600_v7, %v589_v6 }
 0x4f2   :  { %v582_v10 = vpop.f32.mrf.mxu2 }
 0x4f3   :  { %v617_v11 = vmax.f32 %v2478_v9, 0.0  ;;  %v2616_v9 = vmul.u32 3, %v2202_v5 }
 0x4f4   :  { %v500_v12 = vpop.f32.mrf.mxu0 }
 0x4f5   :  { %v538_v13 = vadd.f32 %v537_v8, %v500_v12  ;;  %626 = vrot.lane.b32.xlu1 %v617_v11, %s2159_s14  ;;  %vm712_vm11 = vcmp.eq.s32.totalorder %v2210_v14, %v2616_v9 }
 0x4f7   :  { %v590_v17 = vadd.f32 %v582_v10, %v538_v13  ;;  %v713_v10 = vsel %vm712_vm11, 1.0, %v2164_v26  ;;  %v881_v13 = vadd.s32 2, %v2616_v9  ;;  %vm2145_vm11 = vcmp.ne.s32.totalorder %v2202_v5, 2 }
 0x4f8   :  { %v540_v20 = vpop.f32.mrf.mxu1  ;;  %2029 = vmatpush.msk.msrb.mxu0 %vm2918_vm12, %v713_v10 }
 0x4f9   :  { %v2484_v19 = vadd.f32 %v605_v18, %v590_v17  ;;  %vm882_vm14 = vcmp.eq.s32.totalorder %v2210_v14, %v881_v13 }
 0x4fa   :  { %v585_v25 = vpop.f32.mrf.mxu2  ;;  %v883_v17 = vsel %vm882_vm14, 1.0, %v2164_v26  ;;  %vm2931_vm14 = vcmask 7168  }
 0x4fb   :  { %v618_v23 = vmax.f32 %v2484_v19, 0.0  ;;  %2047 = vmatpush.msk.msra.mxu0 %vm2918_vm12, %v883_v17 }
 0x4fc   :  { %v503_v24 = vpop.f32.mrf.mxu0 }
 0x4fd   :  { %v541_v27 = vadd.f32 %v540_v20, %v503_v24  ;;  %798 = vrot.lane.b32.xlu1 %v2489_v22, %s2167_s7  ;;  %628 = vrot.lane.b32.xlu2 %v618_v23, %s2159_s14 }
 0x4ff   :  { %v591_v31 = vadd.f32 %v585_v25, %v541_v27 }
 0x501   :  { %v2497_v33 = vadd.f32 %v610_v32, %v591_v31 }
 0x503   :  { %v619_v36 = vmax.f32 %v2497_v33, 0.0 }
 0x505   :  { %802 = vrot.lane.b32.xlu1 %v2502_v34, %s2167_s7  ;;  %800 = vrot.lane.b32.xlu2 %v2507_v35, %s2167_s7 }
 0x506   :  { %630 = vrot.lane.b32.xlu0 %v619_v36, %s2159_s14 }
 0x50d   :  { %920 = vrot.lane.b32.xlu1 %v2502_v34, %s2168_s29  ;;  %918 = vrot.lane.b32.xlu2 %v2507_v35, %s2168_s29 }
 0x50e   :  { %916 = vrot.lane.b32.xlu0 %v2489_v22, %s2168_s29 }
 0x515   :  { %981 = vperm.xlu1 %2158, %v967_v37   ;;  %922 = vrot.lane.b32.xlu2 %v2529_v38, %s2168_s29 }
 0x516   :  { %804 = vrot.lane.b32.xlu0 %v2529_v38, %s2167_s7 }
 0x51d   :  { %1237 = vperm.xlu1 %2158, %v1231_v40   ;;  %976 = vperm.xlu2 %2156, %v966_v41  }
 0x51e   :  { %986 = vperm.xlu0 %2157, %v968_v42  }
 0x525   :  { %1242 = vperm.xlu1 %2158, %v1232_v43   ;;  %1003 = vperm.xlu2 %2156, %v997_v44  }
 0x526   :  { %971 = vperm.xlu0 %2157, %v965_v45  }
 0x52d   :  { %1247 = vperm.xlu1 %2158, %v1233_v46   ;;  %1008 = vperm.xlu2 %2156, %v998_v47  }
 0x52e   :  { %1075 = vperm.xlu0 %2157, %v1069_v48  }
 0x535   :  { %1252 = vperm.xlu1 %2158, %v1234_v49   ;;  %1013 = vperm.xlu2 %2156, %v999_v50  }
 0x536   :  { %1080 = vperm.xlu0 %2157, %v1070_v51  }
 0x53d   :  { %1018 = vperm.xlu2 %2156, %v1000_v54  }
 0x53e   :  { %1085 = vperm.xlu0 %2157, %v1071_v55  }
 0x546   :  { %1090 = vperm.xlu0 %2157, %v1072_v60  }
 0x557   :  { %v629_v4 = vpop.permute.xlu2 %628 }
 0x558   :  { %v638_v6 = vsel %vm2916_vm8, %v629_v4, 0.0 }
 0x559   :  { %v642_v7 = vmax.f32 %v618_v23, %v638_v6 }
 0x55f   :  { %v625_v61 = vpop.permute.xlu0 %624  ;;  %v801_v42 = vpop.permute.xlu2 %800 }
 0x560   :  { %v636_v62 = vsel %vm2916_vm8, %v625_v61, 0.0 }
 0x561   :  { %v640_v63 = vmax.f32 %v616_v2, %v636_v62 }
 0x563   :  { %2025 = vmatmul.msk.f32.vlgmr.msra.gmra.mxu3 %vm2915_vm4, %v640_v63 }
 0x567   :  { %v627_v15 = vpop.permute.xlu1 %626 }
 0x568   :  { %v637_v0 = vsel %vm2916_vm8, %v627_v15, 0.0 }
 0x569   :  { %v641_v3 = vmax.f32 %v617_v11, %v637_v0  ;;  %v759_v11 = vadd.s32 1, %v2616_v9 }
 0x56b   :  { %2026 = vmatmul.msk.f32.gmra.mxu3 %vm2915_vm4, %v641_v3  ;;  %vm760_vm3 = vcmp.eq.s32.totalorder %v2210_v14, %v759_v11 }
 0x56c   :  { %v761_v12 = vsel %vm760_vm3, 1.0, %v2164_v26  ;;  %vm1379_vm3 = vcmask 39936  }
 0x56d   :  { %2034 = vmatpush.msk.msrb.mxu1 %vm2918_vm12, %v761_v12 }
 0x56f   :  { %v799_v40 = vpop.permute.xlu1 %798 }
 0x573   :  { %2027 = vmatmul.msk.f32.gmra.mxu3 %vm2915_vm4, %v642_v7 }
 0x577   :  { %v803_v45 = vpop.permute.xlu1 %802 }
 0x578   :  { %v631_v1 = vpop.permute.xlu0 %630 }
 0x579   :  { %v639_v2 = vsel %vm2916_vm8, %v631_v1, 0.0 }
 0x57a   :  { %v643_v8 = vmax.f32 %v619_v36, %v639_v2 }
 0x57c   :  { %2028 = vmatmul.msk.f32.gmra.mxu3 %vm2915_vm4, %v643_v8 }
 0x580   :  { %v917_v44 = vpop.permute.xlu0 %916 }
 0x588   :  { %v805_v47 = vpop.permute.xlu0 %804 }
 0x590   :  { %v987_v63 = vpop.permute.xlu0 %986 }
 0x598   :  { %v972_v13 = vpop.permute.xlu0 %971 }
 0x5e6   :  { %v695_v18 = vpop.f32.mrf.mxu3 }
 0x5e7   :  { %2030 = vmatmul.msk.f32.vlgmr.msrb.gmra.mxu0 %vm2917_vm2, %v695_v18  ;;  %2035 = vmatmul.msk.f32.vlgmr.msrb.gmra.mxu1 %vm2917_vm2, %v695_v18 }
 0x5ee   :  { %v698_v19 = vpop.f32.mrf.mxu3 }
 0x5ef   :  { %2031 = vmatmul.msk.f32.gmra.mxu0 %vm2917_vm2, %v698_v19  ;;  %2036 = vmatmul.msk.f32.gmra.mxu1 %vm2917_vm2, %v698_v19 }
 0x5f6   :  { %v701_v20 = vpop.f32.mrf.mxu3 }
 0x5f7   :  { %2032 = vmatmul.msk.f32.gmra.mxu0 %vm2917_vm2, %v701_v20  ;;  %2037 = vmatmul.msk.f32.gmra.mxu1 %vm2917_vm2, %v701_v20 }
 0x5ff   :  { %v704_v23 = vpop.f32.mrf.mxu3 }
 0x600   :  { %2033 = vmatmul.msk.f32.gmra.mxu0 %vm2917_vm2, %v704_v23  ;;  %2038 = vmatmul.msk.f32.gmra.mxu1 %vm2917_vm2, %v704_v23 }
 0x608   :  { %2048 = vmatmul.msk.f32.vlgmr.msra.gmra.mxu0 %vm2917_vm2, %v695_v18  ;;  %v993_v18 = vld [vmem:[%s2900_s1 + $0x78] sm:$0xff] }
 0x610   :  { %2049 = vmatmul.msk.f32.gmra.mxu0 %vm2917_vm2, %v698_v19  ;;  %v1065_v19 = vld [vmem:[%s2900_s1 + $0x98] sm:$0xff] }
 0x618   :  { %2050 = vmatmul.msk.f32.gmra.mxu0 %vm2917_vm2, %v701_v20  ;;  %v994_v20 = vld [vmem:[%s2900_s1 + $0x80] sm:$0xff] }
 0x620   :  { %2051 = vmatmul.msk.f32.gmra.mxu0 %vm2917_vm2, %v704_v23  ;;  %v1066_v23 = vld [vmem:[%s2900_s1 + $0xa0] sm:$0xff] }
 0x664   :  { %v747_v24 = vpop.f32.mrf.mxu0  ;;  %v782_v25 = vpop.f32.mrf.mxu1 }
 0x66c   :  { %v750_v27 = vpop.f32.mrf.mxu0  ;;  %v785_v31 = vpop.f32.mrf.mxu1 }
 0x674   :  { %v753_v32 = vpop.f32.mrf.mxu0  ;;  %v788_v33 = vpop.f32.mrf.mxu1 }
 0x67d   :  { %v756_v36 = vpop.f32.mrf.mxu0  ;;  %v791_v37 = vpop.f32.mrf.mxu1 }
 0x67e   :  { %827 = vmatpush.msrb.mxu2 %v791_v37  ;;  %864 = vmatpush.msrb.mxu3 %v756_v36  ;;  %v1229_v36 = vld [vmem:[%s2900_s1 + $0xc8] sm:$0xff]  ;;  %v1230_v37 = vld [vmem:[%s2900_s1 + $0xd0] sm:$0xff] }
 0x680   :  { %828 = vmatpush.msrb.mxu2 %v788_v33  ;;  %865 = vmatpush.msrb.mxu3 %v753_v32  ;;  %v1227_v32 = vld [vmem:[%s2900_s1 + $0xb8] sm:$0xff]  ;;  %v1228_v33 = vld [vmem:[%s2900_s1 + $0xc0] sm:$0xff] }
 0x682   :  { %829 = vmatpush.msrb.mxu2 %v785_v31  ;;  %866 = vmatpush.msrb.mxu3 %v750_v27  ;;  %v996_v27 = vld [vmem:[%s2900_s1 + $0x90] sm:$0xff] }
 0x683   :  { %v1068_v31 = vld [vmem:[%s2900_s1 + $0xb0] sm:$0xff] }
 0x684   :  { %830 = vmatpush.msrb.mxu2 %v782_v25  ;;  %867 = vmatpush.msrb.mxu3 %v747_v24  ;;  %v995_v24 = vld [vmem:[%s2900_s1 + $0x88] sm:$0xff] }
 0x685   :  { %v904_v41 = vpop.f32.mrf.mxu0  ;;  %2039 = vmatmul.msk.f32.vlgmr.msrb.gmra.mxu2 %vm806_vm7, %v799_v40  ;;  %2043 = vmatmul.msk.f32.vlgmr.msrb.gmra.mxu3 %vm806_vm7, %v2489_v22  ;;  %v919_v22 = vpop.permute.xlu2 %918  ;;  %v1067_v25 = vld [vmem:[%s2900_s1 + $0xa8] sm:$0xff]  ;;  %v1062_v40 = vmul.u32 3, %v2210_v14 }
 0x687   :  { %vm1063_vm15 = vcmp.eq.s32.totalorder %v2202_v5, %v1062_v40 }
 0x68d   :  { %v907_v43 = vpop.f32.mrf.mxu0  ;;  %2040 = vmatmul.msk.f32.gmra.mxu2 %vm806_vm7, %v801_v42  ;;  %2044 = vmatmul.msk.f32.gmra.mxu3 %vm806_vm7, %v2507_v35  ;;  %v921_v35 = vpop.permute.xlu1 %920 }
 0x695   :  { %v910_v46 = vpop.f32.mrf.mxu0  ;;  %2041 = vmatmul.msk.f32.gmra.mxu2 %vm806_vm7, %v803_v45  ;;  %2045 = vmatmul.msk.f32.gmra.mxu3 %vm806_vm7, %v2502_v34  ;;  %v923_v34 = vpop.permute.xlu2 %922 }
 0x696   :  { %v982_v2 = vpop.permute.xlu1 %981  ;;  %v1076_v45 = vpop.permute.xlu0 %1075 }
 0x69d   :  { %v913_v48 = vpop.f32.mrf.mxu0  ;;  %2042 = vmatmul.msk.f32.gmra.mxu2 %vm806_vm7, %v805_v47  ;;  %2046 = vmatmul.msk.f32.gmra.mxu3 %vm806_vm7, %v2529_v38  ;;  %v977_v11 = vpop.permute.xlu2 %976 }
 0x69e   :  { %944 = vmatpush.msra.mxu1 %v913_v48 }
 0x6a0   :  { %945 = vmatpush.msra.mxu1 %v910_v46  ;;  %v1296_v46 = vadd.s32 2, %v1062_v40 }
 0x6a2   :  { %946 = vmatpush.msra.mxu1 %v907_v43  ;;  %v1064_v43 = vsel %vm1063_vm15, 1.0, %v2164_v26  ;;  %vm1297_vm6 = vcmp.eq.s32.totalorder %v2202_v5, %v1296_v46 }
 0x6a3   :  { %v1298_v47 = vsel %vm1297_vm6, 1.0, %v2164_v26 }
 0x6a4   :  { %947 = vmatpush.msra.mxu1 %v904_v41  ;;  %v1134_v41 = vadd.s32 1, %v1062_v40 }
 0x6a5   :  { %2052 = vmatmul.msk.f32.vlgmr.msra.gmra.mxu1 %vm806_vm7, %v917_v44  ;;  %v1004_v44 = vpop.permute.xlu2 %1003 }
 0x6a6   :  { %vm1135_vm1 = vcmp.eq.s32.totalorder %v2202_v5, %v1134_v41  ;;  %2069 = vmatpush.msk.msrb.mxu1 %vm1150_vm13, %v1064_v43 }
 0x6a7   :  { %v1136_v42 = vsel %vm1135_vm1, 1.0, %v2164_v26  ;;  %vm2932_vm1 = vmmov %vm2931_vm14 }
 0x6a8   :  { %2064 = vmatpush.msk.msrb.mxu0 %vm1150_vm13, %v1136_v42  ;;  %vm2934_vm15 = vmmov %vm2932_vm1 }
 0x6ad   :  { %2053 = vmatmul.msk.f32.gmra.mxu1 %vm806_vm7, %v919_v22 }
 0x6b5   :  { %2054 = vmatmul.msk.f32.gmra.mxu1 %vm806_vm7, %v921_v35 }
 0x6bd   :  { %2055 = vmatmul.msk.f32.gmra.mxu1 %vm806_vm7, %v923_v34 }
 0x708   :  { %v832_v49 = vpop.f32.mrf.mxu2  ;;  %v869_v50 = vpop.f32.mrf.mxu3 }
 0x709   :  { %v870_v3 = vadd.f32 %v869_v50, %v832_v49  ;;  %v1009_v49 = vpop.permute.xlu2 %1008  ;;  %v1081_v50 = vpop.permute.xlu0 %1080 }
 0x710   :  { %v835_v51 = vpop.f32.mrf.mxu2  ;;  %v872_v52 = vpop.f32.mrf.mxu3 }
 0x711   :  { %v873_v15 = vadd.f32 %v872_v52, %v835_v51 }
 0x718   :  { %v838_v53 = vpop.f32.mrf.mxu2  ;;  %v875_v55 = vpop.f32.mrf.mxu3 }
 0x719   :  { %v876_v61 = vadd.f32 %v875_v55, %v838_v53  ;;  %v1086_v55 = vpop.permute.xlu0 %1085 }
 0x720   :  { %v841_v59 = vpop.f32.mrf.mxu2  ;;  %v878_v60 = vpop.f32.mrf.mxu3 }
 0x721   :  { %v879_v62 = vadd.f32 %v878_v60, %v841_v59 }
 0x722   :  { %v949_v38 = vpop.f32.mrf.mxu1 }
 0x723   :  { %v961_v8 = vadd.f32 %v949_v38, %v870_v3 }
 0x725   :  { %v989_v17 = vadd.f32 %v972_v13, %v961_v8 }
 0x72a   :  { %v952_v54 = vpop.f32.mrf.mxu1 }
 0x72b   :  { %v962_v7 = vadd.f32 %v952_v54, %v873_v15  ;;  %v1014_v54 = vpop.permute.xlu2 %1013 }
 0x72d   :  { %v990_v12 = vadd.f32 %v977_v11, %v962_v7 }
 0x732   :  { %v955_v57 = vpop.f32.mrf.mxu1 }
 0x733   :  { %v963_v4 = vadd.f32 %v955_v57, %v876_v61 }
 0x735   :  { %v991_v10 = vadd.f32 %v982_v2, %v963_v4 }
 0x73a   :  { %v958_v0 = vpop.f32.mrf.mxu1 }
 0x73b   :  { %v964_v6 = vadd.f32 %v958_v0, %v879_v62  ;;  %v1019_v62 = vpop.permute.xlu2 %1018 }
 0x73d   :  { %v992_v1 = vadd.f32 %v987_v63, %v964_v6  ;;  %v1091_v63 = vpop.permute.xlu0 %1090  ;;  %v1238_v6 = vpop.permute.xlu1 %1237 }
 0x73f   :  { %1045 = vmatpush.msra.mxu2 %v992_v1  ;;  %1117 = vmatpush.msra.mxu3 %v992_v1 }
 0x741   :  { %1046 = vmatpush.msra.mxu2 %v991_v10  ;;  %1118 = vmatpush.msra.mxu3 %v991_v10 }
 0x743   :  { %1047 = vmatpush.msra.mxu2 %v990_v12  ;;  %1119 = vmatpush.msra.mxu3 %v990_v12 }
 0x745   :  { %1048 = vmatpush.msra.mxu2 %v989_v17  ;;  %1120 = vmatpush.msra.mxu3 %v989_v17  ;;  %v1243_v2 = vpop.permute.xlu1 %1242 }
 0x746   :  { %2056 = vmatmul.msk.f32.vlgmr.msra.gmra.mxu2 %vm806_vm7, %v993_v18  ;;  %2060 = vmatmul.msk.f32.vlgmr.msra.gmra.mxu3 %vm806_vm7, %v1065_v19 }
 0x747   :  { %1279 = vmatpush.msrb.mxu2 %v992_v1  ;;  %2078 = vmatpush.msk.msrb.mxu3 %vm1150_vm13, %v1298_v47  ;;  %vm2933_vm13 = vmmov %vm2932_vm1 }
 0x749   :  { %1280 = vmatpush.msrb.mxu2 %v991_v10 }
 0x74b   :  { %1281 = vmatpush.msrb.mxu2 %v990_v12 }
 0x74d   :  { %1282 = vmatpush.msrb.mxu2 %v989_v17  ;;  %v1248_v11 = vpop.permute.xlu1 %1247 }
 0x74e   :  { %2057 = vmatmul.msk.f32.gmra.mxu2 %vm806_vm7, %v994_v20  ;;  %2061 = vmatmul.msk.f32.gmra.mxu3 %vm806_vm7, %v1066_v23 }
 0x755   :  { %v1253_v17 = vpop.permute.xlu1 %1252 }
 0x756   :  { %2058 = vmatmul.msk.f32.gmra.mxu2 %vm806_vm7, %v995_v24  ;;  %2062 = vmatmul.msk.f32.gmra.mxu3 %vm806_vm7, %v1067_v25 }
 0x75e   :  { %2059 = vmatmul.msk.f32.gmra.mxu2 %vm806_vm7, %v996_v27  ;;  %2063 = vmatmul.msk.f32.gmra.mxu3 %vm806_vm7, %v1068_v31 }
 0x766   :  { %2074 = vmatmul.msk.f32.vlgmr.msrb.gmra.mxu2 %vm806_vm7, %v1227_v32 }
 0x76e   :  { %2075 = vmatmul.msk.f32.gmra.mxu2 %vm806_vm7, %v1228_v33 }
 0x776   :  { %2076 = vmatmul.msk.f32.gmra.mxu2 %vm806_vm7, %v1229_v36 }
 0x77e   :  { %2077 = vmatmul.msk.f32.gmra.mxu2 %vm806_vm7, %v1230_v37 }
 0x7c9   :  { %v1050_v48 = vpop.f32.mrf.mxu2  ;;  %v1122_v22 = vpop.f32.mrf.mxu3 }
 0x7ca   :  { %v1051_v35 = vadd.f32 %v1050_v48, %v1004_v44  ;;  %v1123_v34 = vadd.f32 %v1122_v22, %v1076_v45 }
 0x7cc   :  { %2065 = vmatmul.msk.f32.vlgmr.msrb.gmra.mxu0 %vm1137_vm5, %v1123_v34  ;;  %2070 = vmatmul.msk.f32.vlgmr.msrb.gmra.mxu1 %vm1137_vm5, %v1051_v35  ;;  %v1394_v35 = vld [vmem:[%s2900_s1 + $0x38] sm:$0xff]  ;;  %v1395_v34 = vld [vmem:[%s2900_s1 + $0x40] sm:$0xff] }
 0x7d1   :  { %v1053_v51 = vpop.f32.mrf.mxu2  ;;  %v1125_v52 = vpop.f32.mrf.mxu3 }
 0x7d2   :  { %v1054_v38 = vadd.f32 %v1053_v51, %v1009_v49  ;;  %v1126_v53 = vadd.f32 %v1125_v52, %v1081_v50  ;;  %v1397_v49 = vld [vmem:[%s2901_s2 + $0x40] sm:$0xff]  ;;  %v1396_v50 = vld [vmem:[%s2901_s2 + $0x38] sm:$0xff] }
 0x7d4   :  { %2066 = vmatmul.msk.f32.gmra.mxu0 %vm1137_vm5, %v1126_v53  ;;  %2071 = vmatmul.msk.f32.gmra.mxu1 %vm1137_vm5, %v1054_v38 }
 0x7d9   :  { %v1056_v57 = vpop.f32.mrf.mxu2  ;;  %v1128_v59 = vpop.f32.mrf.mxu3 }
 0x7da   :  { %v1057_v60 = vadd.f32 %v1056_v57, %v1014_v54  ;;  %v1129_v61 = vadd.f32 %v1128_v59, %v1086_v55 }
 0x7dc   :  { %2067 = vmatmul.msk.f32.gmra.mxu0 %vm1137_vm5, %v1129_v61  ;;  %2072 = vmatmul.msk.f32.gmra.mxu1 %vm1137_vm5, %v1057_v60 }
 0x7e1   :  { %v1059_v15 = vpop.f32.mrf.mxu2  ;;  %v1131_v0 = vpop.f32.mrf.mxu3 }
 0x7e2   :  { %v1060_v3 = vadd.f32 %v1059_v15, %v1019_v62  ;;  %v1132_v4 = vadd.f32 %v1131_v0, %v1091_v63 }
 0x7e4   :  { %2068 = vmatmul.msk.f32.gmra.mxu0 %vm1137_vm5, %v1132_v4  ;;  %2073 = vmatmul.msk.f32.gmra.mxu1 %vm1137_vm5, %v1060_v3 }
 0x7e9   :  { %v1284_v7 = vpop.f32.mrf.mxu2 }
 0x7ea   :  { %v1285_v1 = vadd.f32 %v1284_v7, %v1238_v6 }
 0x7ec   :  { %2079 = vmatmul.msk.f32.vlgmr.msrb.gmra.mxu3 %vm1137_vm5, %v1285_v1 }
 0x7f1   :  { %v1287_v8 = vpop.f32.mrf.mxu2 }
 0x7f2   :  { %v1288_v10 = vadd.f32 %v1287_v8, %v1243_v2  ;;  %v2105_v8 = vadd.s32 4294967293, %v2210_v14 }
 0x7f4   :  { %2080 = vmatmul.msk.f32.gmra.mxu3 %vm1137_vm5, %v1288_v10  ;;  %v2779_v10 = vadd.s32 1, %v2210_v14  ;;  %vm1517_vm6 = vcmp.ge.s32.totalorder %v2105_v8, 0 }
 0x7f9   :  { %v1290_v12 = vpop.f32.mrf.mxu2 }
 0x7fa   :  { %v1291_v13 = vadd.f32 %v1290_v12, %v1248_v11  ;;  %v1525_v11 = vadd.s32 1, %v2105_v8  ;;  %v1509_v12 = vmul.u32 7, %v2210_v14 }
 0x7fc   :  { %2081 = vmatmul.msk.f32.gmra.mxu3 %vm1137_vm5, %v1291_v13  ;;  %v1521_v13 = vmul.u32 7, %v2105_v8 }
 0x801   :  { %v1293_v18 = vpop.f32.mrf.mxu2 }
 0x802   :  { %v1294_v19 = vadd.f32 %v1293_v18, %v1253_v17  ;;  %v1522_v17 = vmul.u32 3, %v2357_v56  ;;  %v1513_v18 = vmul.u32 7, %v2779_v10 }
 0x804   :  { %2082 = vmatmul.msk.f32.gmra.mxu3 %vm1137_vm5, %v1294_v19  ;;  %vm1507_vm5 = vcmp.lt.s32.totalorder %v2210_v14, 3  ;;  %v1526_v19 = vmul.u32 7, %v1525_v11 }
 0x806   :  { %vm1527_vm8 = vcmp.lt.s32.totalorder %v1522_v17, %v1526_v19  ;;  %v1754_v19 = vld [vmem:[%s2901_s2 + $0x50] sm:$0xf] }
 0x849   :  { %v1171_v20 = vpop.f32.mrf.mxu0  ;;  %v1215_v23 = vpop.f32.mrf.mxu1 }
 0x84a   :  { %v1216_v24 = vadd.f32 %v1215_v23, %v1171_v20 }
 0x851   :  { %v1174_v25 = vpop.f32.mrf.mxu0  ;;  %v1218_v27 = vpop.f32.mrf.mxu1 }
 0x852   :  { %v1219_v33 = vadd.f32 %v1218_v27, %v1174_v25 }
 0x859   :  { %v1177_v40 = vpop.f32.mrf.mxu0  ;;  %v1221_v41 = vpop.f32.mrf.mxu1 }
 0x85a   :  { %v1222_v42 = vadd.f32 %v1221_v41, %v1177_v40 }
 0x861   :  { %v1180_v45 = vpop.f32.mrf.mxu0  ;;  %v1224_v46 = vpop.f32.mrf.mxu1 }
 0x862   :  { %v1225_v47 = vadd.f32 %v1224_v46, %v1180_v45  ;;  %v1585_v46 = vld [vmem:[%s2900_s1 + $0x48] sm:$0xff] }
 0x86f   :  { %v1331_v31 = vpop.f32.mrf.mxu3 }
 0x870   :  { %v1343_v32 = vadd.f32 %v1331_v31, %v1216_v24 }
 0x872   :  { %1367 = vrot.lane.b32.xlu0 %v1343_v32, %s2159_s14 }
 0x877   :  { %v1334_v36 = vpop.f32.mrf.mxu3 }
 0x878   :  { %v1344_v37 = vadd.f32 %v1334_v36, %v1219_v33 }
 0x87a   :  { %1369 = vrot.lane.b32.xlu1 %v1344_v37, %s2159_s14 }
 0x87f   :  { %v1337_v43 = vpop.f32.mrf.mxu3 }
 0x880   :  { %v1345_v44 = vadd.f32 %v1337_v43, %v1222_v42 }
 0x882   :  { %1371 = vrot.lane.b32.xlu2 %v1345_v44, %s2159_s14 }
 0x887   :  { %v1340_v48 = vpop.f32.mrf.mxu3 }
 0x888   :  { %v1346_v22 = vadd.f32 %v1340_v48, %v1225_v47  ;;  %v1586_v47 = vld [vmem:[%s2901_s2 + $0x48] sm:$0xff] }
 0x88a   :  { %1355 = vrot.lane.b32.xlu2 %v1345_v44, %s2160_s15  ;;  %1357 = vrot.lane.b32.xlu0 %v1346_v22, %s2160_s15 }
 0x88b   :  { %1373 = vrot.lane.b32.xlu1 %v1346_v22, %s2159_s14  ;;  %1420 = vmatpush.msra.mxu0 %v1346_v22 }
 0x88d   :  { %1421 = vmatpush.msra.mxu0 %v1345_v44 }
 0x88f   :  { %1422 = vmatpush.msra.mxu0 %v1344_v37 }
 0x891   :  { %1423 = vmatpush.msra.mxu0 %v1343_v32 }
 0x892   :  { %1458 = vrot.lane.b32.xlu2 %v1394_v35, %s2168_s29  ;;  %1351 = vrot.lane.b32.xlu0 %v1343_v32, %s2160_s15 }
 0x893   :  { %1353 = vrot.lane.b32.xlu1 %v1344_v37, %s2160_s15 }
 0x89a   :  { %1460 = vrot.lane.b32.xlu2 %v1395_v34, %s2168_s29  ;;  %1402 = vrot.lane.b32.xlu0 %v1395_v34, %s2167_s7 }
 0x89b   :  { %1400 = vrot.lane.b32.xlu1 %v1394_v35, %s2167_s7 }
 0x8a2   :  { %1498 = vperm.xlu2 %2156, %v1397_v49  }
 0x8a3   :  { %1493 = vperm.xlu1 %2158, %v1396_v50  }
 0x8dc   :  { %v1372_v51 = vpop.permute.xlu2 %1371 }
 0x8dd   :  { %v1382_v61 = vsel %vm1379_vm3, %v1372_v51, 0.0 }
 0x8e4   :  { %v1368_v52 = vpop.permute.xlu0 %1367  ;;  %v1356_v53 = vpop.permute.xlu2 %1355 }
 0x8e5   :  { %v1365_v60 = vsel %vm2932_vm1, 0.0, %v1356_v53  ;;  %v1380_v15 = vsel %vm1379_vm3, %v1368_v52, 0.0 }
 0x8ec   :  { %v1370_v38 = vpop.permute.xlu1 %1369  ;;  %v1459_v63 = vpop.permute.xlu2 %1458 }
 0x8ed   :  { %v1381_v62 = vsel %vm1379_vm3, %v1370_v38, 0.0 }
 0x8f4   :  { %v1461_v7 = vpop.permute.xlu2 %1460 }
 0x8fc   :  { %v1358_v54 = vpop.permute.xlu0 %1357  ;;  %v1499_v41 = vpop.permute.xlu2 %1498 }
 0x8fd   :  { %v1374_v55 = vpop.permute.xlu1 %1373  ;;  %v1366_v57 = vsel %vm2931_vm14, 0.0, %v1358_v54  ;;  %vm1519_vm14 = vcmp.lt.s32.totalorder %v2105_v8, 3  ;;  %v2121_v54 = vadd.s32 4294967289, %v2299_v39 }
 0x8fe   :  { %v1383_v59 = vsel %vm1379_vm3, %v1374_v55, 0.0  ;;  %2086 = vmatpush.msk.msra.mxu1 %vm2144_vm9, %v1366_v57  ;;  %vm1510_vm3 = vcmp.le.s32.totalorder %v1509_v12, %v2616_v9  ;;  %v2120_v55 = vadd.s32 4294967289, %v2210_v14 }
 0x8ff   :  { %2096 = vmatpush.msk.msra.mxu2 %vm2145_vm11, %v1383_v59  ;;  %v1705_v57 = vadd.s32 1, %v2121_v54  ;;  %v1698_v59 = vmul.u32 15, %v2121_v54 }
 0x900   :  { %2088 = vmatpush.msk.msra.mxu1 %vm2144_vm9, %v1365_v60  ;;  %v1699_v60 = vmul.u32 7, %v2218_v16 }
 0x901   :  { %2098 = vmatpush.msk.msra.mxu2 %vm2145_vm11, %v1382_v61  ;;  %v1704_v61 = vadd.s32 1, %v2120_v55 }
 0x903   :  { %2100 = vmatpush.msk.msra.mxu2 %vm2145_vm11, %v1381_v62  ;;  %v1707_v62 = vmul.u32 15, %v1705_v57  ;;  %v1706_v16 = vmul.u32 15, %v1704_v61 }
 0x904   :  { %v1352_v3 = vpop.permute.xlu0 %1351 }
 0x905   :  { %v1354_v0 = vpop.permute.xlu1 %1353  ;;  %2102 = vmatpush.msk.msra.mxu2 %vm2145_vm11, %v1380_v15  ;;  %v1363_v6 = vsel %vm2934_vm15, 0.0, %v1352_v3  ;;  %vm1523_vm15 = vcmp.le.s32.totalorder %v1521_v13, %v1522_v17  ;;  %v1675_v15 = vmul.u32 7, %v2202_v5  ;;  %v1697_v3 = vmul.u32 15, %v2120_v55 }
 0x906   :  { %v1364_v4 = vsel %vm2933_vm13, 0.0, %v1354_v0  ;;  %2103 = vmatmul.msk.f32.vlgmr.msra.gmra.mxu2 %vm806_vm7, %v1459_v63  ;;  %vm1514_vm13 = vcmp.lt.s32.totalorder %v2616_v9, %v1513_v18  ;;  %v1673_v63 = vmul.u32 15, %v2210_v14  ;;  %v1681_v0 = vmul.u32 15, %v2779_v10 }
 0x907   :  { %2090 = vmatpush.msk.msra.mxu1 %vm2144_vm9, %v1364_v4 }
 0x909   :  { %2092 = vmatpush.msk.msra.mxu1 %vm2144_vm9, %v1363_v6  ;;  %vm1518_vm9 = vmand %vm2363_vm0, %vm1517_vm6  ;;  %vm2936_vm6 = vcmask 1045504  }
 0x90a   :  { %2093 = vmatmul.msk.f32.vlgmr.msra.gmra.mxu1 %vm806_vm7, %v1394_v35  ;;  %vm1520_vm2 = vmand %vm1518_vm9, %vm1519_vm14  ;;  %vm2943_vm9 = vcmask 105472  }
 0x90b   :  { %vm1524_vm12 = vmand %vm1520_vm2, %vm1523_vm15  ;;  %vm1694_vm15 = vcmp.lt.s32.totalorder %v2121_v54, 7 }
 0x90c   :  { %v1403_v2 = vpop.permute.xlu0 %1402  ;;  %vm1528_vm10 = vmand %vm1524_vm12, %vm1527_vm8  ;;  %vm2939_vm12 = vcmask 7168   ;;  %vm2940_vm8 = vcmp.ne.s32.totalorder %v2202_v5, 7 }
 0x90d   :  { %v1401_v1 = vpop.permute.xlu1 %1400  ;;  %vm2942_vm2 = vmmov %vm2939_vm12 }
 0x90e   :  { %2083 = vmatmul.msk.f32.vlgmr.msra.gmra.mxu0 %vm806_vm7, %v1401_v1  ;;  %2104 = vmatmul.msk.f32.gmra.mxu2 %vm806_vm7, %v1461_v7  ;;  %vm2947_vm14 = vmmov %vm2943_vm9 }
 0x912   :  { %2094 = vmatmul.msk.f32.gmra.mxu1 %vm806_vm7, %v1395_v34 }
 0x915   :  { %v1494_v27 = vpop.permute.xlu1 %1493 }
 0x916   :  { %2084 = vmatmul.msk.f32.gmra.mxu0 %vm806_vm7, %v1403_v2  ;;  %vm2935_vm7 = vcmp.lt.s32.totalorder %v2202_v5, 7 }
 0x917   :  { %vm1508_vm11 = vmand %vm2935_vm7, %vm1507_vm5  ;;  %vm2937_vm5 = vcmask 48128  }
 0x918   :  { %vm1511_vm1 = vmand %vm1508_vm11, %vm1510_vm3  ;;  %vm2945_vm11 = vcmp.ne.s32.totalorder %v2202_v5, 6 }
 0x919   :  { %vm1515_vm4 = vmand %vm1511_vm1, %vm1514_vm13 }
 0x91a   :  { %vm1529_vm0 = vmor %vm1515_vm4, %vm1528_vm10  ;;  %vm2941_vm4 = vcmask 130048  }
 0x91b   :  { %v1530_v56 = vsel %vm1529_vm0, 1.0, %v2164_v26  ;;  %vm2938_vm10 = vmmov %vm2937_vm5  ;;  %vm2950_vm0 = vnez %v2922_v21 }
 0x91c   :  { %2106 = vmatpush.msk.msra.mxu3 %vm2936_vm6, %v1530_v56  ;;  %vm2944_vm7 = vmmov %vm2940_vm8 }
 0x91d   :  { %vm2946_vm3 = vmmov %vm2941_vm4 }
 0x91e   :  { %vm2948_vm1 = vmmov %vm2945_vm11 }
 0x91f   :  { %vm2949_vm13 = vmmov %vm2946_vm3 }
 0x920   :  { %vm1696_vm6 = vmand %vm2950_vm0, %vm1694_vm15  ;;  %vm1708_vm0 = vcmp.lt.s32.totalorder %v1699_v60, %v1706_v16 }
 0x987   :  { %v1452_v58 = vpop.f32.mrf.mxu1 }
 0x989   :  { %v1483_v20 = vpop.f32.mrf.mxu2 }
 0x98b   :  { %v1425_v23 = vpop.f32.mrf.mxu0 }
 0x98c   :  { %v1453_v24 = vadd.f32 %v1452_v58, %v1425_v23 }
 0x98e   :  { %v1489_v25 = vadd.f32 %v1483_v20, %v1453_v24 }
 0x98f   :  { %v1455_v32 = vpop.f32.mrf.mxu1 }
 0x990   :  { %v1501_v31 = vadd.f32 %v1494_v27, %v1489_v25  ;;  %v2134_v27 = vadd.s32 4294967281, %v2255_v28  ;;  %v1680_v28 = vadd.s32 1, %v2299_v39 }
 0x991   :  { %v1486_v36 = vpop.f32.mrf.mxu2 }
 0x992   :  { %v1503_v9 = vmax.f32 %v1501_v31, 0.0  ;;  %v2135_v31 = vadd.s32 4294967266, %v2202_v5 }
 0x993   :  { %v1428_v33 = vpop.f32.mrf.mxu0 }
 0x994   :  { %v1456_v37 = vadd.f32 %v1455_v32, %v1428_v33  ;;  %2107 = vmatmul.msk.f32.vlgmr.msra.gmra.mxu3 %vm2937_vm5, %v1503_v9  ;;  %vm1701_vm5 = vcmp.le.s32.totalorder %v1698_v59, %v1699_v60  ;;  %v1916_v32 = vadd.s32 1, %v2134_v27  ;;  %v1903_v9 = vmul.u32 30, %v2134_v27 }
 0x995   :  { %v1904_v33 = vmul.u32 15, %v2135_v31 }
 0x996   :  { %v1490_v40 = vadd.f32 %v1486_v36, %v1456_v37  ;;  %v1920_v37 = vmul.u32 30, %v1916_v32 }
 0x998   :  { %v1502_v42 = vadd.f32 %v1499_v41, %v1490_v40  ;;  %v2133_v40 = vadd.s32 4294967281, %v2267_v30  ;;  %v2132_v41 = vadd.s32 4294967281, %v2299_v39  ;;  %v1865_v30 = vmul.u32 30, %v1680_v28 }
 0x99a   :  { %v1504_v43 = vmax.f32 %v1502_v42, 0.0  ;;  %v1902_v42 = vmul.u32 30, %v2133_v40 }
 0x99c   :  { %2108 = vmatmul.msk.f32.gmra.mxu3 %vm2938_vm10, %v1504_v43  ;;  %vm1669_vm10 = vcmp.lt.s32.totalorder %v2210_v14, 7  ;;  %v1915_v43 = vadd.s32 1, %v2133_v40 }
 0xa17   :  { %v1557_v44 = vpop.f32.mrf.mxu3 }
 0xa18   :  { %1573 = vrot.lane.b32.xlu1 %v1557_v44, %s2159_s14 }
 0xa1f   :  { %v1560_v45 = vpop.f32.mrf.mxu3 }
 0xa20   :  { %1565 = vrot.lane.b32.xlu1 %v1557_v44, %s2160_s15  ;;  %1567 = vrot.lane.b32.xlu2 %v1560_v45, %s2160_s15 }
 0xa21   :  { %1575 = vrot.lane.b32.xlu0 %v1560_v45, %s2159_s14  ;;  %1606 = vmatpush.msrb.mxu0 %v1560_v45  ;;  %v1853_v45 = vmul.u32 15, %v2202_v5 }
 0xa23   :  { %1607 = vmatpush.msrb.mxu0 %v1557_v44  ;;  %v1850_v44 = vmul.u32 30, %v2299_v39 }
 0xa28   :  { %1588 = vrot.lane.b32.xlu2 %v1585_v46, %s2166_s23 }
 0xa29   :  { %1634 = vrot.lane.b32.xlu0 %v1585_v46, %s2167_s7 }
 0xa31   :  { %1661 = vperm.xlu0 %2157, %v1586_v47   ;;  %v1919_v47 = vmul.u32 30, %v1915_v43 }
 0xa7a   :  { %v1568_v48 = vpop.permute.xlu2 %1567 }
 0xa7b   :  { %v1572_v22 = vsel %vm2939_vm12, 0.0, %v1568_v48  ;;  %vm1703_vm12 = vmand %vm1696_vm6, %vm1701_vm5  ;;  %vm2953_vm6 = vnez %v2922_v21  ;;  %v1753_v21 = vld [vmem:[%s2900_s1 + $0x50] sm:$0xf] }
 0xa7c   :  { %2111 = vmatpush.msk.msrb.mxu1 %vm2940_vm8, %v1572_v22  ;;  %vm1709_vm8 = vcmp.lt.s32.totalorder %v1699_v60, %v1707_v62  ;;  %1802 = vrot.lane.b32.xlu0 %v1753_v21, %s2166_s23  ;;  %v1901_v22 = vmul.u32 30, %v2132_v41 }
 0xa82   :  { %v1589_v35 = vpop.permute.xlu2 %1588 }
 0xa83   :  { %2109 = vmatmul.msk.f32.vlgmr.msrb.gmra.mxu0 %vm2941_vm4, %v1589_v35  ;;  %vm1676_vm4 = vcmp.le.s32.totalorder %v1673_v63, %v1675_v15  ;;  %v1849_v35 = vmul.u32 30, %v2210_v14 }
 0xa8a   :  { %v1574_v34 = vpop.permute.xlu1 %1573 }
 0xa8b   :  { %v1579_v38 = vsel %vm2947_vm14, %v1574_v34, 0.0  ;;  %vm2952_vm14 = vcmask 1045504  }
 0xa92   :  { %v1566_v49 = vpop.permute.xlu1 %1565 }
 0xa93   :  { %v1571_v50 = vsel %vm2942_vm2, 0.0, %v1566_v49  ;;  %v1576_v51 = vpop.permute.xlu0 %1575  ;;  %vm1711_vm2 = vmand %vm1703_vm12, %vm1709_vm8  ;;  %v1864_v49 = vmul.u32 30, %v2779_v10 }
 0xa94   :  { %v1580_v52 = vsel %vm2943_vm9, %v1576_v51, 0.0  ;;  %2113 = vmatpush.msk.msrb.mxu1 %vm2944_vm7, %v1571_v50  ;;  %vm1683_vm9 = vcmp.lt.s32.totalorder %v1675_v15, %v1681_v0  ;;  %v1715_v4 = vsel %vm1711_vm2, 1.0, %v2164_v26  ;;  %vm2951_vm7 = vcmp.lt.s32.totalorder %v2202_v5, 15 }
 0xa95   :  { %2116 = vmatpush.msk.msrb.mxu2 %vm2945_vm11, %v1580_v52  ;;  %2114 = vmatmul.msk.f32.vlgmr.msrb.gmra.mxu1 %vm2946_vm3, %v1585_v46  ;;  %vm1671_vm11 = vmand %vm2951_vm7, %vm1669_vm10  ;;  %vm1689_vm3 = vcmp.ge.s32.totalorder %v2120_v55, 0  ;;  %vm2954_vm10 = vcmask 113664   ;;  %vm2958_vm7 = vcmask 7168  }
 0xa96   :  { %2122 = vmatpush.msk.msra.mxu0 %vm2952_vm14, %v1715_v4  ;;  %vm1691_vm5 = vmand %vm2953_vm6, %vm1689_vm3  ;;  %vm1895_vm6 = vcmp.lt.s32.totalorder %v2134_v27, 15 }
 0xa97   :  { %2118 = vmatpush.msk.msrb.mxu2 %vm2948_vm1, %v1579_v38  ;;  %vm1678_vm1 = vmand %vm1671_vm11, %vm1676_vm4  ;;  %vm2956_vm4 = vcmp.ne.s32.totalorder %v2202_v5, 14  ;;  %vm2959_vm11 = vcmp.ne.s32.totalorder %v2202_v5, 15 }
 0xa98   :  { %vm1685_vm15 = vmand %vm1678_vm1, %vm1683_vm9  ;;  %vm2957_vm9 = vcmask 64512   ;;  %vm1881_vm1 = vcmp.ge.s32.totalorder %v2202_v5, 30 }
 0xa99   :  { %vm2960_vm3 = vmmov %vm2957_vm9 }
 0xa9a   :  { %vm2961_vm14 = vmmov %vm2960_vm3 }
 0xa9b   :  { %v1635_v53 = vpop.permute.xlu0 %1634 }
 0xa9c   :  { %2119 = vmatmul.msk.f32.vlgmr.msrb.gmra.mxu2 %vm2949_vm13, %v1635_v53  ;;  %vm1700_vm13 = vcmp.le.s32.totalorder %v1697_v3, %v1699_v60 }
 0xa9d   :  { %vm1702_vm8 = vmand %vm1691_vm5, %vm1700_vm13  ;;  %vm1882_vm13 = vcmp.lt.s32.totalorder %v2202_v5, 60 }
 0xa9e   :  { %vm1710_vm12 = vmand %vm1702_vm8, %vm1708_vm0  ;;  %vm2955_vm0 = vcmask 236544   ;;  %vm1908_vm8 = vcmp.le.s32.totalorder %v1903_v9, %v1904_v33 }
 0xa9f   :  { %vm1712_vm2 = vmor %vm1685_vm15, %vm1710_vm12 }
 0xaa0   :  { %v1714_v6 = vsel %vm1712_vm2, 1.0, %v2164_v26  ;;  %vm2862_vm15 = vmand %vm1881_vm1, %vm1882_vm13  ;;  %vm1924_vm2 = vcmp.lt.s32.totalorder %v1904_v33, %v1920_v37  ;;  %vm1869_vm1 = vcmp.lt.s32.totalorder %v1853_v45, %v1865_v30  ;;  %vm1923_vm13 = vcmp.lt.s32.totalorder %v1904_v33, %v1919_v47 }
 0xaa1   :  { %1737 = vmatpush.msra.mxu0 %v1714_v6  ;;  %vm1899_vm5 = vmand %vm2862_vm15, %vm1895_vm6 }
 0xaa2   :  { %vm1912_vm12 = vmand %vm1899_vm5, %vm1908_vm8  ;;  %vm1885_vm5 = vcmp.ge.s32.totalorder %v2132_v41, 0 }
 0xaa3   :  { %v1662_v12 = vpop.permute.xlu0 %1661 }
 0xaee   :  { %v1803_v58 = vpop.permute.xlu0 %1802 }
 0xb00   :  { %v1609_v7 = vpop.f32.mrf.mxu0 }
 0xb12   :  { %v1631_v1 = vpop.f32.mrf.mxu1 }
 0xb13   :  { %v1632_v2 = vadd.f32 %v1631_v1, %v1609_v7 }
 0xb1f   :  { %v1655_v8 = vpop.f32.mrf.mxu2 }
 0xb20   :  { %v1658_v11 = vadd.f32 %v1655_v8, %v1632_v2 }
 0xb22   :  { %v1664_v13 = vadd.f32 %v1662_v12, %v1658_v11 }
 0xb24   :  { %v1665_v17 = vmax.f32 %v1664_v13, 0.0 }
 0xb26   :  { %2123 = vmatmul.msk.f32.vlgmr.msra.gmra.mxu0 %vm2954_vm10, %v1665_v17  ;;  %vm1928_vm10 = vmand %vm1912_vm12, %vm1924_vm2  ;;  %vm1906_vm12 = vcmp.le.s32.totalorder %v1901_v22, %v1904_v33 }
 0xb27   :  { %v1936_v46 = vsel %vm1928_vm10, 1.0, %v2164_v26  ;;  %vm1889_vm10 = vmand %vm2862_vm15, %vm1885_vm5 }
 0xba3   :  { %v1739_v18 = vpop.f32.mrf.mxu0 }
 0xba4   :  { %1747 = vrot.lane.b32.xlu2 %v1739_v18, %s2159_s14  ;;  %1743 = vrot.lane.b32.xlu1 %v1739_v18, %s2160_s15 }
 0xba5   :  { %1775 = vmatpush.msra.mxu1 %v1739_v18 }
 0xbac   :  { %1829 = vperm.xlu2 %2156, %v1754_v19   ;;  %1756 = vrot.lane.b32.xlu1 %v1753_v21, %s2161_s18 }
 0xbfe   :  { %v1748_v56 = vpop.permute.xlu2 %1747 }
 0xbff   :  { %v1750_v20 = vsel %vm2955_vm0, %v1748_v56, 0.0  ;;  %vm1842_vm0 = vcmp.lt.s32.totalorder %v2299_v39, 15  ;;  %v1914_v39 = vadd.s32 1, %v2132_v41 }
 0xc00   :  { %2129 = vmatpush.msk.msrb.mxu3 %vm2956_vm4, %v1750_v20  ;;  %vm1907_vm4 = vcmp.le.s32.totalorder %v1902_v42, %v1904_v33 }
 0xc01   :  { %2130 = vmatmul.msk.f32.vlgmr.msrb.gmra.mxu3 %vm2957_vm9, %v1803_v58  ;;  %vm2964_vm9 = vcmp.lt.s32.totalorder %v2202_v5, 30  ;;  %v1918_v34 = vmul.u32 30, %v1914_v39 }
 0xc06   :  { %v1830_v53 = vpop.permute.xlu2 %1829 }
 0xc16   :  { %v1744_v23 = vpop.permute.xlu1 %1743 }
 0xc17   :  { %v1746_v24 = vsel %vm2958_vm7, 0.0, %v1744_v23  ;;  %vm2877_vm7 = vmand %vm2964_vm9, %vm1842_vm0  ;;  %vm1922_vm0 = vcmp.lt.s32.totalorder %v1904_v33, %v1918_v34  ;;  %vm1854_vm9 = vcmp.le.s32.totalorder %v1849_v35, %v1853_v45 }
 0xc18   :  { %2126 = vmatpush.msk.msra.mxu2 %vm2959_vm11, %v1746_v24  ;;  %vm2967_vm11 = vcmask 1045504  }
 0xc19   :  { %2127 = vmatmul.msk.f32.vlgmr.msra.gmra.mxu2 %vm2960_vm3, %v1753_v21  ;;  %2136 = vmatpush.msk.msrb.mxu0 %vm2967_vm11, %v1936_v46  ;;  %vm1911_vm3 = vmand %vm2862_vm15, %vm1907_vm4  ;;  %vm2969_vm15 = vcmask 244736  }
 0xc1a   :  { %vm1927_vm8 = vmand %vm1911_vm3, %vm1923_vm13  ;;  %vm2968_vm3 = vcmp.lt.s32.totalorder %v2202_v5, 30 }
 0xc1b   :  { %2137 = vmatpush.msk.msrb.mxu0 %vm1927_vm8, %v2165_v29  ;;  %vm1910_vm4 = vmand %vm1889_vm10, %vm1906_vm12 }
 0xc1c   :  { %vm1926_vm11 = vmand %vm1910_vm4, %vm1922_vm0 }
 0xc1d   :  { %vm1858_vm13 = vmand %vm2968_vm3, %vm1854_vm9 }
 0xc1e   :  { %v1757_v25 = vpop.permute.xlu1 %1756 }
 0xc1f   :  { %2124 = vmatmul.msk.f32.vlgmr.msra.gmra.mxu1 %vm2961_vm14, %v1757_v25  ;;  %vm1855_vm14 = vcmp.le.s32.totalorder %v1850_v44, %v1853_v45 }
 0xc20   :  { %vm1859_vm6 = vmand %vm2877_vm7, %vm1855_vm14  ;;  %vm1868_vm7 = vcmp.lt.s32.totalorder %v1853_v45, %v1864_v49 }
 0xc21   :  { %vm1873_vm2 = vmand %vm1859_vm6, %vm1869_vm1  ;;  %vm1963_vm1 = vcmask 486400  }
 0xc22   :  { %vm1930_vm14 = vmor %vm1873_vm2, %vm1926_vm11 }
 0xc23   :  { %v1934_v50 = vsel %vm1930_vm14, 1.0, %v2164_v26  ;;  %vm1872_vm8 = vmand %vm1858_vm13, %vm1868_vm7 }
 0xc24   :  { %1957 = vmatpush.msrb.mxu0 %v1934_v50 }
 0xc26   :  { %2138 = vmatpush.msk.msrb.mxu0 %vm1872_vm8, %v2165_v29 }
 0xc84   :  { %v1823_v14 = vpop.f32.mrf.mxu3 }
 0xc9c   :  { %v1777_v10 = vpop.f32.mrf.mxu1  ;;  %v1799_v51 = vpop.f32.mrf.mxu2 }
 0xc9d   :  { %v1800_v52 = vadd.f32 %v1799_v51, %v1777_v10 }
 0xc9f   :  { %v1826_v38 = vadd.f32 %v1823_v14, %v1800_v52 }
 0xca1   :  { %v1832_v54 = vadd.f32 %v1830_v53, %v1826_v38 }
 0xca3   :  { %v1833_v55 = vmax.f32 %v1832_v54, 0.0 }
 0xca5   :  { %2139 = vmatmul.msk.f32.vlgmr.msrb.gmra.mxu0 %vm2969_vm15, %v1833_v55 }
 0xd22   :  { %v1960_v57 = vpop.f32.mrf.mxu0 }
 0xd23   :  { %1964 = vst.msk [vmem:[%s2902_s3] sm:$0xf] %vm1963_vm1, %v1960_v57 }

</bundles_post_ra>
